<compile_context>
chip_gen: v7x
topology: tpu7x:2x2x1
jax: 0.10.0
libtpu: 0.0.40
codegen_flags: <defaults>
</compile_context>

<pallas_src>
import functools

import jax
import jax.numpy as jnp
from jax import lax
from jax.experimental import pallas as pl
from jax.experimental.pallas import tpu as pltpu  # noqa: F401  (TPU backend)


# ----------------------------------------------------------------------------
# Small helpers used inside the kernels
# ----------------------------------------------------------------------------
def _full_spec(shape):
    nd = len(shape)
    return pl.BlockSpec(shape, lambda i, _nd=nd: (0,) * _nd)


def _one_hot_gather(row, n_edges, n_nodes):
    """row: (E, 1) int32 -> (E, N) f32 one-hot selecting source nodes."""
    node_iota = lax.broadcasted_iota(jnp.int32, (n_edges, n_nodes), 1)
    return (jnp.broadcast_to(row, (n_edges, n_nodes)) == node_iota).astype(
        jnp.float32)


def _one_hot_scatter(col, n_edges, n_nodes):
    """col: (1, E) int32 -> (N, E) f32 one-hot accumulating into dest nodes."""
    node_iota = lax.broadcasted_iota(jnp.int32, (n_nodes, n_edges), 0)
    return (jnp.broadcast_to(col, (n_nodes, n_edges)) == node_iota).astype(
        jnp.float32)


def _edge_term(ea, w1b):
    """edge_attr @ W_edge; use VPU outer product when edge_h == 1."""
    if w1b.shape[0] == 1:
        return ea * w1b                                  # (E,1)*(1,H) broadcast
    return jnp.dot(ea, w1b, preferred_element_type=jnp.float32)


def _node_layer(x, ea, gather, scatter, cnt, w1a, w1b, b1, w2a, w2b, b2):
    """One NodeModel layer (standard, un-split node features)."""
    x_row = jnp.dot(gather, x, preferred_element_type=jnp.float32)
    h = jnp.maximum(
        jnp.dot(x_row, w1a, preferred_element_type=jnp.float32)
        + _edge_term(ea, w1b) + b1, 0.0)
    agg = jnp.dot(scatter, h, preferred_element_type=jnp.float32) / cnt
    return jnp.maximum(
        jnp.dot(x, w2a, preferred_element_type=jnp.float32)
        + jnp.dot(agg, w2b, preferred_element_type=jnp.float32) + b2, 0.0)


# ----------------------------------------------------------------------------
# Kernel 1: x_embed + group aggregation + all group_gnn layers
# ----------------------------------------------------------------------------
def _make_group_stage_kernel(batch, city_num, group_num, gnn_layer):
    n_nodes = batch * group_num

    def kernel(*refs):
        (x_ref, we_ref, be_ref, wt_ref, row_ref, col_ref, ea_ref) = refs[:7]
        w_refs = refs[7:7 + 6 * gnn_layer]
        xe_ref, gx_ref = refs[7 + 6 * gnn_layer:]

        # x_embed Linear (no activation in the reference module)
        xe = (jnp.dot(x_ref[...], we_ref[...],
                      preferred_element_type=jnp.float32) + be_ref[...])
        xe_ref[...] = xe                                  # (B*C, x_em)

        # per-batch group aggregation: g_x[b] = trans_w.T @ xe[b]
        wt = wt_ref[...]                                  # (G, C), shared
        gx_parts = [
            jnp.dot(wt, xe[b * city_num:(b + 1) * city_num, :],
                    preferred_element_type=jnp.float32)
            for b in range(batch)
        ]
        x = jnp.concatenate(gx_parts, axis=0)             # (B*G, x_em)

        # gather / scatter / counts built once, reused by every layer
        n_edges = ea_ref.shape[0]
        gather = _one_hot_gather(row_ref[...], n_edges, n_nodes)
        scatter = _one_hot_scatter(col_ref[...], n_edges, n_nodes)
        cnt = jnp.maximum(jnp.sum(scatter, axis=1, keepdims=True), 1.0)

        ea = ea_ref[...]
        for l in range(gnn_layer):
            w1a, w1b, b1, w2a, w2b, b2 = (
                r[...] for r in w_refs[6 * l:6 * l + 6])
            x = _node_layer(x, ea, gather, scatter, cnt,
                            w1a, w1b, b1, w2a, w2b, b2)
        gx_ref[...] = x                                   # (B*G, gnn_h)

    return kernel


# ----------------------------------------------------------------------------
# Kernel 2: group->city aggregation + all global_gnn layers (concat fused away)
# ----------------------------------------------------------------------------
def _make_global_stage_kernel(batch, city_num, group_num, gnn_layer):
    n_nodes = batch * city_num

    def kernel(*refs):
        (xe_ref, gx_ref, w_ref, row_ref, col_ref, ea_ref) = refs[:6]
        w_refs = refs[6:-1]
        o_ref = refs[-1]

        # per-batch group -> city: nx[b] = trans_w @ g_x[b]
        w = w_ref[...]                                    # (C, G), shared
        gx = gx_ref[...]                                  # (B*G, gnn_h)
        nx_parts = [
            jnp.dot(w, gx[b * group_num:(b + 1) * group_num, :],
                    preferred_element_type=jnp.float32)
            for b in range(batch)
        ]
        nx = jnp.concatenate(nx_parts, axis=0)            # (B*C, gnn_h)
        xe = xe_ref[...]                                  # (B*C, x_em)

        n_edges = ea_ref.shape[0]
        gather = _one_hot_gather(row_ref[...], n_edges, n_nodes)
        scatter = _one_hot_scatter(col_ref[...], n_edges, n_nodes)
        cnt = jnp.maximum(jnp.sum(scatter, axis=1, keepdims=True), 1.0)
        ea = ea_ref[...]

        # layer 0: node features are cat([xe, nx]) -- handled via split weights
        (w1a_xe, w1a_nx, w1b, b1, w2a_xe, w2a_nx, w2b, b2) = (
            r[...] for r in w_refs[:8])
        xe_row = jnp.dot(gather, xe, preferred_element_type=jnp.float32)
        nx_row = jnp.dot(gather, nx, preferred_element_type=jnp.float32)
        h = jnp.maximum(
            jnp.dot(xe_row, w1a_xe, preferred_element_type=jnp.float32)
            + jnp.dot(nx_row, w1a_nx, preferred_element_type=jnp.float32)
            + _edge_term(ea, w1b) + b1, 0.0)
        agg = jnp.dot(scatter, h, preferred_element_type=jnp.float32) / cnt
        x = jnp.maximum(
            jnp.dot(xe, w2a_xe, preferred_element_type=jnp.float32)
            + jnp.dot(nx, w2a_nx, preferred_element_type=jnp.float32)
            + jnp.dot(agg, w2b, preferred_element_type=jnp.float32) + b2, 0.0)

        # remaining standard layers
        for l in range(1, gnn_layer):
            w1a, w1b, b1, w2a, w2b, b2 = (
                r[...] for r in w_refs[8 + 6 * (l - 1):8 + 6 * l])
            x = _node_layer(x, ea, gather, scatter, cnt,
                            w1a, w1b, b1, w2a, w2b, b2)
        o_ref[...] = x                                    # (B*C, gnn_h)

    return kernel


# ----------------------------------------------------------------------------
# DecoderModule forward (two pallas_calls)
# ----------------------------------------------------------------------------
def decoder_forward(params, x, trans_w, g_edge_index, g_edge_w,
                    edge_index, edge_w, *, city_num, group_num, gnn_layer):
    bc, _ = x.shape
    batch = bc // city_num
    x_em = params["x_embed_w"].shape[1]
    gnn_h = params["group_gnn"][0]["b1"].shape[1]

    wt = jnp.transpose(trans_w)                            # (G, C)
    g_row = g_edge_index[0].reshape(-1, 1).astype(jnp.int32)
    g_col = g_edge_index[1].reshape(1, -1).astype(jnp.int32)
    e_row = edge_index[0].reshape(-1, 1).astype(jnp.int32)
    e_col = edge_index[1].reshape(1, -1).astype(jnp.int32)

    # ---- stage 1: embed + group aggregation + group GNN stack --------------
    group_w_flat = []
    for p in params["group_gnn"]:
        group_w_flat += [p["w1a"], p["w1b"], p["b1"],
                         p["w2a"], p["w2b"], p["b2"]]
    n_g_nodes = batch * group_num
    in1 = [x, params["x_embed_w"], params["x_embed_b"], wt,
           g_row, g_col, g_edge_w] + group_w_flat
    xe, g_x = pl.pallas_call(
        _make_group_stage_kernel(batch, city_num, group_num, gnn_layer),
        out_shape=(jax.ShapeDtypeStruct((bc, x_em), jnp.float32),
                   jax.ShapeDtypeStruct((n_g_nodes, gnn_h), jnp.float32)),
        grid=(1,),
        in_specs=[_full_spec(a.shape) for a in in1],
        out_specs=(_full_spec((bc, x_em)), _full_spec((n_g_nodes, gnn_h))),
    )(*in1)

    # ---- stage 2: group->city aggregation + global GNN stack ---------------
    global_w_flat = []
    p0 = params["global_gnn"][0]
    global_w_flat += [p0["w1a_xe"], p0["w1a_nx"], p0["w1b"], p0["b1"],
                      p0["w2a_xe"], p0["w2a_nx"], p0["w2b"], p0["b2"]]
    for p in params["global_gnn"][1:]:
        global_w_flat += [p["w1a"], p["w1b"], p["b1"],
                          p["w2a"], p["w2b"], p["b2"]]
    in2 = [xe, g_x, trans_w, e_row, e_col, edge_w] + global_w_flat
    new_x = pl.pallas_call(
        _make_global_stage_kernel(batch, city_num, group_num, gnn_layer),
        out_shape=jax.ShapeDtypeStruct((bc, gnn_h), jnp.float32),
        grid=(1,),
        in_specs=[_full_spec(a.shape) for a in in2],
        out_specs=_full_spec((bc, gnn_h)),
    )(*in2)
    return new_x                                           # (B*C, gnn_h)


# ----------------------------------------------------------------------------
# Deterministic parameter init (synthetic; shapes follow __init__).
# Weights stored transposed (in, out) and pre-split so concats are fused away.
# ----------------------------------------------------------------------------
def _init_linear(key, in_dim, out_dim):
    kw, kb = jax.random.split(key)
    scale = 1.0 / (in_dim ** 0.5)
    w = jax.random.normal(kw, (in_dim, out_dim), jnp.float32) * scale
    b = jax.random.normal(kb, (out_dim,), jnp.float32) * 0.01
    return w, b


def _init_node_model(key, node_h, edge_h, gnn_h):
    k1, k2 = jax.random.split(key)
    w1, b1 = _init_linear(k1, node_h + edge_h, gnn_h)
    w2, b2 = _init_linear(k2, node_h + gnn_h, gnn_h)
    return {"w1a": w1[:node_h], "w1b": w1[node_h:], "b1": b1.reshape(1, gnn_h),
            "w2a": w2[:node_h], "w2b": w2[node_h:], "b2": b2.reshape(1, gnn_h)}


def _init_node_model_split(key, x_em, gnn_h, edge_h):
    """First global_gnn layer: node_h = x_em + gnn_h, weights split for fusion."""
    p = _init_node_model(key, x_em + gnn_h, edge_h, gnn_h)
    return {"w1a_xe": p["w1a"][:x_em], "w1a_nx": p["w1a"][x_em:],
            "w1b": p["w1b"], "b1": p["b1"],
            "w2a_xe": p["w2a"][:x_em], "w2a_nx": p["w2a"][x_em:],
            "w2b": p["w2b"], "b2": p["b2"]}


def init_decoder_params(key, x_em, edge_h, gnn_h, gnn_layer):
    keys = jax.random.split(key, 1 + 2 * gnn_layer)
    xe_w, xe_b = _init_linear(keys[0], gnn_h, x_em)
    group_gnn, global_gnn = [], []
    for i in range(gnn_layer):
        node_h_g = x_em if i == 0 else gnn_h
        group_gnn.append(_init_node_model(keys[1 + i], node_h_g, edge_h, gnn_h))
    global_gnn.append(_init_node_model_split(keys[1 + gnn_layer], x_em, gnn_h, 1))
    for i in range(1, gnn_layer):
        global_gnn.append(
            _init_node_model(keys[1 + gnn_layer + i], gnn_h, 1, gnn_h))
    return {"x_embed_w": xe_w, "x_embed_b": xe_b.reshape(1, x_em),
            "group_gnn": group_gnn, "global_gnn": global_gnn}


# ----------------------------------------------------------------------------
if __name__ == "__main__":
    # Small, forward-consistent sizes.
    x_em, edge_h, gnn_h, gnn_layer = 16, 8, 32, 2
    city_num, group_num, batch = 16, 4, 2

    root = jax.random.PRNGKey(0)
    k_param, k_x, k_tw, k_gew, k_er, k_ec, k_ew = jax.random.split(root, 7)

    params = init_decoder_params(k_param, x_em, edge_h, gnn_h, gnn_layer)

    # Inputs
    x = jax.random.normal(k_x, (batch * city_num, gnn_h), jnp.float32)
    trans_w = jax.nn.softmax(
        jax.random.normal(k_tw, (city_num, group_num), jnp.float32), axis=-1)

    # Group graph: fully-connected directed (no self loops) within each batch.
    g_src, g_dst = [], []
    for b in range(batch):
        for i in range(group_num):
            for j in range(group_num):
                if i != j:
                    g_src.append(b * group_num + i)
                    g_dst.append(b * group_num + j)
    g_edge_index = jnp.array([g_src, g_dst], dtype=jnp.int32)
    g_edge_w = jax.random.normal(k_gew, (len(g_src), edge_h), jnp.float32)

    # City graph: random directed edges within each batch.
    e_per_batch = 32
    n_edges = batch * e_per_batch
    rows = jax.random.randint(k_er, (n_edges,), 0, city_num)
    cols = jax.random.randint(k_ec, (n_edges,), 0, city_num)
    offs = jnp.repeat(jnp.arange(batch, dtype=jnp.int32) * city_num,
                      e_per_batch)
    edge_index = jnp.stack([rows.astype(jnp.int32) + offs,
                            cols.astype(jnp.int32) + offs], axis=0)
    edge_w = jax.random.normal(k_ew, (n_edges, 1), jnp.float32)

    fwd = jax.jit(functools.partial(
        decoder_forward, city_num=city_num, group_num=group_num,
        gnn_layer=gnn_layer))
    out = fwd(params, x, trans_w, g_edge_index, g_edge_w, edge_index, edge_w)
    out = jax.block_until_ready(out)

    assert out.shape == (batch * city_num, gnn_h), out.shape
    assert bool(jnp.all(jnp.isfinite(out)))
    print("KERNEL_OK")
</pallas_src>

<mosaic_0001>
module attributes {stable_mosaic.version = 11 : i64} {
  func.func @kernel(%arg0: i32, %arg1: memref<32x32xf32, #tpu.memory_space<vmem>>, %arg2: memref<32x16xf32, #tpu.memory_space<vmem>>, %arg3: memref<1x16xf32, #tpu.memory_space<vmem>>, %arg4: memref<4x16xf32, #tpu.memory_space<vmem>>, %arg5: memref<24x1xi32, #tpu.memory_space<vmem>>, %arg6: memref<1x24xi32, #tpu.memory_space<vmem>>, %arg7: memref<24x8xf32, #tpu.memory_space<vmem>>, %arg8: memref<16x32xf32, #tpu.memory_space<vmem>>, %arg9: memref<8x32xf32, #tpu.memory_space<vmem>>, %arg10: memref<1x32xf32, #tpu.memory_space<vmem>>, %arg11: memref<16x32xf32, #tpu.memory_space<vmem>>, %arg12: memref<32x32xf32, #tpu.memory_space<vmem>>, %arg13: memref<1x32xf32, #tpu.memory_space<vmem>>, %arg14: memref<32x32xf32, #tpu.memory_space<vmem>>, %arg15: memref<8x32xf32, #tpu.memory_space<vmem>>, %arg16: memref<1x32xf32, #tpu.memory_space<vmem>>, %arg17: memref<32x32xf32, #tpu.memory_space<vmem>>, %arg18: memref<32x32xf32, #tpu.memory_space<vmem>>, %arg19: memref<1x32xf32, #tpu.memory_space<vmem>>, %arg20: memref<32x16xf32, #tpu.memory_space<vmem>>, %arg21: memref<8x32xf32, #tpu.memory_space<vmem>>) attributes {dimension_semantics = [#tpu.dimension_semantics<arbitrary>], iteration_bounds = array<i64: 1>, scalar_prefetch = 0 : i64, scratch_operands = 0 : i64, tpu.core_type = #tpu.core_type<tc>, window_params = [{pipeline_mode = #tpu.pipeline_mode<synchronous>, transform_indices = @transform_0, window_bounds = array<i64: 32, 32>}, {pipeline_mode = #tpu.pipeline_mode<synchronous>, transform_indices = @transform_1, window_bounds = array<i64: 32, 16>}, {pipeline_mode = #tpu.pipeline_mode<synchronous>, transform_indices = @transform_2, window_bounds = array<i64: 1, 16>}, {pipeline_mode = #tpu.pipeline_mode<synchronous>, transform_indices = @transform_3, window_bounds = array<i64: 4, 16>}, {pipeline_mode = #tpu.pipeline_mode<synchronous>, transform_indices = @transform_4, window_bounds = array<i64: 24, 1>}, {pipeline_mode = #tpu.pipeline_mode<synchronous>, transform_indices = @transform_5, window_bounds = array<i64: 1, 24>}, {pipeline_mode = #tpu.pipeline_mode<synchronous>, transform_indices = @transform_6, window_bounds = array<i64: 24, 8>}, {pipeline_mode = #tpu.pipeline_mode<synchronous>, transform_indices = @transform_7, window_bounds = array<i64: 16, 32>}, {pipeline_mode = #tpu.pipeline_mode<synchronous>, transform_indices = @transform_8, window_bounds = array<i64: 8, 32>}, {pipeline_mode = #tpu.pipeline_mode<synchronous>, transform_indices = @transform_9, window_bounds = array<i64: 1, 32>}, {pipeline_mode = #tpu.pipeline_mode<synchronous>, transform_indices = @transform_10, window_bounds = array<i64: 16, 32>}, {pipeline_mode = #tpu.pipeline_mode<synchronous>, transform_indices = @transform_11, window_bounds = array<i64: 32, 32>}, {pipeline_mode = #tpu.pipeline_mode<synchronous>, transform_indices = @transform_12, window_bounds = array<i64: 1, 32>}, {pipeline_mode = #tpu.pipeline_mode<synchronous>, transform_indices = @transform_13, window_bounds = array<i64: 32, 32>}, {pipeline_mode = #tpu.pipeline_mode<synchronous>, transform_indices = @transform_14, window_bounds = array<i64: 8, 32>}, {pipeline_mode = #tpu.pipeline_mode<synchronous>, transform_indices = @transform_15, window_bounds = array<i64: 1, 32>}, {pipeline_mode = #tpu.pipeline_mode<synchronous>, transform_indices = @transform_16, window_bounds = array<i64: 32, 32>}, {pipeline_mode = #tpu.pipeline_mode<synchronous>, transform_indices = @transform_17, window_bounds = array<i64: 32, 32>}, {pipeline_mode = #tpu.pipeline_mode<synchronous>, transform_indices = @transform_18, window_bounds = array<i64: 1, 32>}, {pipeline_mode = #tpu.pipeline_mode<synchronous>, transform_indices = @transform_19, window_bounds = array<i64: 32, 16>}, {pipeline_mode = #tpu.pipeline_mode<synchronous>, transform_indices = @transform_20, window_bounds = array<i64: 8, 32>}]} {
    %c0 = arith.constant 0 : index
    %c0_0 = arith.constant 0 : index
    %0 = vector.load %arg1[%c0, %c0_0] : memref<32x32xf32, #tpu.memory_space<vmem>>, vector<32x32xf32>
    %c0_1 = arith.constant 0 : index
    %c0_2 = arith.constant 0 : index
    %1 = vector.load %arg2[%c0_1, %c0_2] : memref<32x16xf32, #tpu.memory_space<vmem>>, vector<32x16xf32>
    %cst = arith.constant dense<0.000000e+00> : vector<32x16xf32>
    %2 = tpu.matmul %0, %1, %cst {dimension_numbers = #tpu.dot_dimension_numbers<[1], [0], [0], [1], [0, 0, 1, 1], [], []>} : vector<32x32xf32>, vector<32x16xf32>, vector<32x16xf32> -> vector<32x16xf32>
    %c0_3 = arith.constant 0 : index
    %c0_4 = arith.constant 0 : index
    %3 = vector.load %arg3[%c0_3, %c0_4] : memref<1x16xf32, #tpu.memory_space<vmem>>, vector<1x16xf32>
    %4 = vector.broadcast %3 : vector<1x16xf32> to vector<32x16xf32>
    %5 = arith.addf %2, %4 : vector<32x16xf32>
    %c0_5 = arith.constant 0 : index
    %c0_6 = arith.constant 0 : index
    %6 = vector.load %arg20[%c0_5, %c0_6] : memref<32x16xf32, #tpu.memory_space<vmem>>, vector<32x16xf32>
    tpu.vector_store %arg20[%c0_5, %c0_6], %5 {strides = array<i32>} : memref<32x16xf32, #tpu.memory_space<vmem>>, vector<32x16xf32>,
    %c0_7 = arith.constant 0 : index
    %c0_8 = arith.constant 0 : index
    %7 = vector.load %arg4[%c0_7, %c0_8] : memref<4x16xf32, #tpu.memory_space<vmem>>, vector<4x16xf32>
    %8 = vector.extract_strided_slice %5 {offsets = [0, 0], sizes = [16, 16], strides = [1, 1]} : vector<32x16xf32> to vector<16x16xf32>
    %cst_9 = arith.constant dense<0.000000e+00> : vector<4x16xf32>
    %9 = tpu.matmul %7, %8, %cst_9 {dimension_numbers = #tpu.dot_dimension_numbers<[1], [0], [0], [1], [0, 0, 1, 1], [], []>} : vector<4x16xf32>, vector<16x16xf32>, vector<4x16xf32> -> vector<4x16xf32>
    %10 = vector.extract_strided_slice %5 {offsets = [16, 0], sizes = [16, 16], strides = [1, 1]} : vector<32x16xf32> to vector<16x16xf32>
    %cst_10 = arith.constant dense<0.000000e+00> : vector<4x16xf32>
    %11 = tpu.matmul %7, %10, %cst_10 {dimension_numbers = #tpu.dot_dimension_numbers<[1], [0], [0], [1], [0, 0, 1, 1], [], []>} : vector<4x16xf32>, vector<16x16xf32>, vector<4x16xf32> -> vector<4x16xf32>
    %12 = tpu.concatenate %9, %11 in 0 : vector<4x16xf32>, vector<4x16xf32> -> vector<8x16xf32>
    %c0_11 = arith.constant 0 : index
    %c0_12 = arith.constant 0 : index
    %13 = vector.load %arg5[%c0_11, %c0_12] : memref<24x1xi32, #tpu.memory_space<vmem>>, vector<24x1xi32>
    %14 = tpu.iota {dimensions = array<i32: 1>} : vector<24x8xi32>
    %15 = vector.shape_cast %13 : vector<24x1xi32> to vector<24x1xi32>
    %16 = vector.broadcast %15 : vector<24x1xi32> to vector<24x8xi32>
    %17 = arith.cmpi eq, %16, %14 : vector<24x8xi32>
    %18 = arith.extui %17 : vector<24x8xi1> to vector<24x8xi32>
    %19 = arith.sitofp %18 : vector<24x8xi32> to vector<24x8xf32>
    %c0_13 = arith.constant 0 : index
    %c0_14 = arith.constant 0 : index
    %20 = vector.load %arg6[%c0_13, %c0_14] : memref<1x24xi32, #tpu.memory_space<vmem>>, vector<1x24xi32>
    %21 = tpu.iota {dimensions = array<i32: 0>} : vector<8x24xi32>
    %22 = vector.shape_cast %20 : vector<1x24xi32> to vector<1x24xi32>
    %23 = vector.broadcast %22 : vector<1x24xi32> to vector<8x24xi32>
    %24 = arith.cmpi eq, %23, %21 : vector<8x24xi32>
    %25 = arith.extui %24 : vector<8x24xi1> to vector<8x24xi32>
    %26 = arith.sitofp %25 : vector<8x24xi32> to vector<8x24xf32>
    %cst_15 = arith.constant dense<0.000000e+00> : vector<8xf32>
    %27 = vector.multi_reduction <add>, %26, %cst_15 [1] : vector<8x24xf32> to vector<8xf32>
    %28 = vector.shape_cast %27 : vector<8xf32> to vector<8x1xf32>
    %cst_16 = arith.constant 1.000000e+00 : f32
    %29 = vector.broadcast %cst_16 : f32 to vector<8x1xf32>
    %30 = arith.maximumf %28, %29 : vector<8x1xf32>
    %c0_17 = arith.constant 0 : index
    %c0_18 = arith.constant 0 : index
    %31 = vector.load %arg7[%c0_17, %c0_18] : memref<24x8xf32, #tpu.memory_space<vmem>>, vector<24x8xf32>
    %c0_19 = arith.constant 0 : index
    %c0_20 = arith.constant 0 : index
    %32 = vector.load %arg8[%c0_19, %c0_20] : memref<16x32xf32, #tpu.memory_space<vmem>>, vector<16x32xf32>
    %c0_21 = arith.constant 0 : index
    %c0_22 = arith.constant 0 : index
    %33 = vector.load %arg9[%c0_21, %c0_22] : memref<8x32xf32, #tpu.memory_space<vmem>>, vector<8x32xf32>
    %c0_23 = arith.constant 0 : index
    %c0_24 = arith.constant 0 : index
    %34 = vector.load %arg10[%c0_23, %c0_24] : memref<1x32xf32, #tpu.memory_space<vmem>>, vector<1x32xf32>
    %c0_25 = arith.constant 0 : index
    %c0_26 = arith.constant 0 : index
    %35 = vector.load %arg11[%c0_25, %c0_26] : memref<16x32xf32, #tpu.memory_space<vmem>>, vector<16x32xf32>
    %c0_27 = arith.constant 0 : index
    %c0_28 = arith.constant 0 : index
    %36 = vector.load %arg12[%c0_27, %c0_28] : memref<32x32xf32, #tpu.memory_space<vmem>>, vector<32x32xf32>
    %c0_29 = arith.constant 0 : index
    %c0_30 = arith.constant 0 : index
    %37 = vector.load %arg13[%c0_29, %c0_30] : memref<1x32xf32, #tpu.memory_space<vmem>>, vector<1x32xf32>
    %cst_31 = arith.constant dense<0.000000e+00> : vector<24x16xf32>
    %38 = tpu.matmul %19, %12, %cst_31 {dimension_numbers = #tpu.dot_dimension_numbers<[1], [0], [0], [1], [0, 0, 1, 1], [], []>} : vector<24x8xf32>, vector<8x16xf32>, vector<24x16xf32> -> vector<24x16xf32>
    %cst_32 = arith.constant dense<0.000000e+00> : vector<24x32xf32>
    %39 = tpu.matmul %38, %32, %cst_32 {dimension_numbers = #tpu.dot_dimension_numbers<[1], [0], [0], [1], [0, 0, 1, 1], [], []>} : vector<24x16xf32>, vector<16x32xf32>, vector<24x32xf32> -> vector<24x32xf32>
    %cst_33 = arith.constant dense<0.000000e+00> : vector<24x32xf32>
    %40 = tpu.matmul %31, %33, %cst_33 {dimension_numbers = #tpu.dot_dimension_numbers<[1], [0], [0], [1], [0, 0, 1, 1], [], []>} : vector<24x8xf32>, vector<8x32xf32>, vector<24x32xf32> -> vector<24x32xf32>
    %41 = arith.addf %39, %40 : vector<24x32xf32>
    %42 = vector.broadcast %34 : vector<1x32xf32> to vector<24x32xf32>
    %43 = arith.addf %41, %42 : vector<24x32xf32>
    %cst_34 = arith.constant 0.000000e+00 : f32
    %44 = vector.broadcast %cst_34 : f32 to vector<24x32xf32>
    %45 = arith.maximumf %43, %44 : vector<24x32xf32>
    %cst_35 = arith.constant dense<0.000000e+00> : vector<8x32xf32>
    %46 = tpu.matmul %26, %45, %cst_35 {dimension_numbers = #tpu.dot_dimension_numbers<[1], [0], [0], [1], [0, 0, 1, 1], [], []>} : vector<8x24xf32>, vector<24x32xf32>, vector<8x32xf32> -> vector<8x32xf32>
    %47 = vector.broadcast %30 : vector<8x1xf32> to vector<8x32xf32>
    %48 = arith.divf %46, %47 : vector<8x32xf32>
    %cst_36 = arith.constant dense<0.000000e+00> : vector<8x32xf32>
    %49 = tpu.matmul %12, %35, %cst_36 {dimension_numbers = #tpu.dot_dimension_numbers<[1], [0], [0], [1], [0, 0, 1, 1], [], []>} : vector<8x16xf32>, vector<16x32xf32>, vector<8x32xf32> -> vector<8x32xf32>
    %cst_37 = arith.constant dense<0.000000e+00> : vector<8x32xf32>
    %50 = tpu.matmul %48, %36, %cst_37 {dimension_numbers = #tpu.dot_dimension_numbers<[1], [0], [0], [1], [0, 0, 1, 1], [], []>} : vector<8x32xf32>, vector<32x32xf32>, vector<8x32xf32> -> vector<8x32xf32>
    %51 = arith.addf %49, %50 : vector<8x32xf32>
    %52 = vector.broadcast %37 : vector<1x32xf32> to vector<8x32xf32>
    %53 = arith.addf %51, %52 : vector<8x32xf32>
    %cst_38 = arith.constant 0.000000e+00 : f32
    %54 = vector.broadcast %cst_38 : f32 to vector<8x32xf32>
    %55 = arith.maximumf %53, %54 : vector<8x32xf32>
    %c0_39 = arith.constant 0 : index
    %c0_40 = arith.constant 0 : index
    %56 = vector.load %arg14[%c0_39, %c0_40] : memref<32x32xf32, #tpu.memory_space<vmem>>, vector<32x32xf32>
    %c0_41 = arith.constant 0 : index
    %c0_42 = arith.constant 0 : index
    %57 = vector.load %arg15[%c0_41, %c0_42] : memref<8x32xf32, #tpu.memory_space<vmem>>, vector<8x32xf32>
    %c0_43 = arith.constant 0 : index
    %c0_44 = arith.constant 0 : index
    %58 = vector.load %arg16[%c0_43, %c0_44] : memref<1x32xf32, #tpu.memory_space<vmem>>, vector<1x32xf32>
    %c0_45 = arith.constant 0 : index
    %c0_46 = arith.constant 0 : index
    %59 = vector.load %arg17[%c0_45, %c0_46] : memref<32x32xf32, #tpu.memory_space<vmem>>, vector<32x32xf32>
    %c0_47 = arith.constant 0 : index
    %c0_48 = arith.constant 0 : index
    %60 = vector.load %arg18[%c0_47, %c0_48] : memref<32x32xf32, #tpu.memory_space<vmem>>, vector<32x32xf32>
    %c0_49 = arith.constant 0 : index
    %c0_50 = arith.constant 0 : index
    %61 = vector.load %arg19[%c0_49, %c0_50] : memref<1x32xf32, #tpu.memory_space<vmem>>, vector<1x32xf32>
    %cst_51 = arith.constant dense<0.000000e+00> : vector<24x32xf32>
    %62 = tpu.matmul %19, %55, %cst_51 {dimension_numbers = #tpu.dot_dimension_numbers<[1], [0], [0], [1], [0, 0, 1, 1], [], []>} : vector<24x8xf32>, vector<8x32xf32>, vector<24x32xf32> -> vector<24x32xf32>
    %cst_52 = arith.constant dense<0.000000e+00> : vector<24x32xf32>
    %63 = tpu.matmul %62, %56, %cst_52 {dimension_numbers = #tpu.dot_dimension_numbers<[1], [0], [0], [1], [0, 0, 1, 1], [], []>} : vector<24x32xf32>, vector<32x32xf32>, vector<24x32xf32> -> vector<24x32xf32>
    %cst_53 = arith.constant dense<0.000000e+00> : vector<24x32xf32>
    %64 = tpu.matmul %31, %57, %cst_53 {dimension_numbers = #tpu.dot_dimension_numbers<[1], [0], [0], [1], [0, 0, 1, 1], [], []>} : vector<24x8xf32>, vector<8x32xf32>, vector<24x32xf32> -> vector<24x32xf32>
    %65 = arith.addf %63, %64 : vector<24x32xf32>
    %66 = vector.broadcast %58 : vector<1x32xf32> to vector<24x32xf32>
    %67 = arith.addf %65, %66 : vector<24x32xf32>
    %cst_54 = arith.constant 0.000000e+00 : f32
    %68 = vector.broadcast %cst_54 : f32 to vector<24x32xf32>
    %69 = arith.maximumf %67, %68 : vector<24x32xf32>
    %cst_55 = arith.constant dense<0.000000e+00> : vector<8x32xf32>
    %70 = tpu.matmul %26, %69, %cst_55 {dimension_numbers = #tpu.dot_dimension_numbers<[1], [0], [0], [1], [0, 0, 1, 1], [], []>} : vector<8x24xf32>, vector<24x32xf32>, vector<8x32xf32> -> vector<8x32xf32>
    %71 = vector.broadcast %30 : vector<8x1xf32> to vector<8x32xf32>
    %72 = arith.divf %70, %71 : vector<8x32xf32>
    %cst_56 = arith.constant dense<0.000000e+00> : vector<8x32xf32>
    %73 = tpu.matmul %55, %59, %cst_56 {dimension_numbers = #tpu.dot_dimension_numbers<[1], [0], [0], [1], [0, 0, 1, 1], [], []>} : vector<8x32xf32>, vector<32x32xf32>, vector<8x32xf32> -> vector<8x32xf32>
    %cst_57 = arith.constant dense<0.000000e+00> : vector<8x32xf32>
    %74 = tpu.matmul %72, %60, %cst_57 {dimension_numbers = #tpu.dot_dimension_numbers<[1], [0], [0], [1], [0, 0, 1, 1], [], []>} : vector<8x32xf32>, vector<32x32xf32>, vector<8x32xf32> -> vector<8x32xf32>
    %75 = arith.addf %73, %74 : vector<8x32xf32>
    %76 = vector.broadcast %61 : vector<1x32xf32> to vector<8x32xf32>
    %77 = arith.addf %75, %76 : vector<8x32xf32>
    %cst_58 = arith.constant 0.000000e+00 : f32
    %78 = vector.broadcast %cst_58 : f32 to vector<8x32xf32>
    %79 = arith.maximumf %77, %78 : vector<8x32xf32>
    %c0_59 = arith.constant 0 : index
    %c0_60 = arith.constant 0 : index
    %80 = vector.load %arg21[%c0_59, %c0_60] : memref<8x32xf32, #tpu.memory_space<vmem>>, vector<8x32xf32>
    tpu.vector_store %arg21[%c0_59, %c0_60], %79 {strides = array<i32>} : memref<8x32xf32, #tpu.memory_space<vmem>>, vector<8x32xf32>,
    return
  }
  func.func @transform_0(%arg0: i32) -> (i32, i32) {
    %c0_i32 = arith.constant 0 : i32
    %c0_i32_0 = arith.constant 0 : i32
    %c0_i32_1 = arith.constant 0 : i32
    return %c0_i32, %c0_i32_0 : i32, i32
  }
  func.func @transform_1(%arg0: i32) -> (i32, i32) {
    %c0_i32 = arith.constant 0 : i32
    %c0_i32_0 = arith.constant 0 : i32
    %c0_i32_1 = arith.constant 0 : i32
    return %c0_i32, %c0_i32_0 : i32, i32
  }
  func.func @transform_2(%arg0: i32) -> (i32, i32) {
    %c0_i32 = arith.constant 0 : i32
    %c0_i32_0 = arith.constant 0 : i32
    %c0_i32_1 = arith.constant 0 : i32
    return %c0_i32, %c0_i32_0 : i32, i32
  }
  func.func @transform_3(%arg0: i32) -> (i32, i32) {
    %c0_i32 = arith.constant 0 : i32
    %c0_i32_0 = arith.constant 0 : i32
    %c0_i32_1 = arith.constant 0 : i32
    return %c0_i32, %c0_i32_0 : i32, i32
  }
  func.func @transform_4(%arg0: i32) -> (i32, i32) {
    %c0_i32 = arith.constant 0 : i32
    %c0_i32_0 = arith.constant 0 : i32
    %c0_i32_1 = arith.constant 0 : i32
    return %c0_i32, %c0_i32_0 : i32, i32
  }
  func.func @transform_5(%arg0: i32) -> (i32, i32) {
    %c0_i32 = arith.constant 0 : i32
    %c0_i32_0 = arith.constant 0 : i32
    %c0_i32_1 = arith.constant 0 : i32
    return %c0_i32, %c0_i32_0 : i32, i32
  }
  func.func @transform_6(%arg0: i32) -> (i32, i32) {
    %c0_i32 = arith.constant 0 : i32
    %c0_i32_0 = arith.constant 0 : i32
    %c0_i32_1 = arith.constant 0 : i32
    return %c0_i32, %c0_i32_0 : i32, i32
  }
  func.func @transform_7(%arg0: i32) -> (i32, i32) {
    %c0_i32 = arith.constant 0 : i32
    %c0_i32_0 = arith.constant 0 : i32
    %c0_i32_1 = arith.constant 0 : i32
    return %c0_i32, %c0_i32_0 : i32, i32
  }
  func.func @transform_8(%arg0: i32) -> (i32, i32) {
    %c0_i32 = arith.constant 0 : i32
    %c0_i32_0 = arith.constant 0 : i32
    %c0_i32_1 = arith.constant 0 : i32
    return %c0_i32, %c0_i32_0 : i32, i32
  }
  func.func @transform_9(%arg0: i32) -> (i32, i32) {
    %c0_i32 = arith.constant 0 : i32
    %c0_i32_0 = arith.constant 0 : i32
    %c0_i32_1 = arith.constant 0 : i32
    return %c0_i32, %c0_i32_0 : i32, i32
  }
  func.func @transform_10(%arg0: i32) -> (i32, i32) {
    %c0_i32 = arith.constant 0 : i32
    %c0_i32_0 = arith.constant 0 : i32
    %c0_i32_1 = arith.constant 0 : i32
    return %c0_i32, %c0_i32_0 : i32, i32
  }
  func.func @transform_11(%arg0: i32) -> (i32, i32) {
    %c0_i32 = arith.constant 0 : i32
    %c0_i32_0 = arith.constant 0 : i32
    %c0_i32_1 = arith.constant 0 : i32
    return %c0_i32, %c0_i32_0 : i32, i32
  }
  func.func @transform_12(%arg0: i32) -> (i32, i32) {
    %c0_i32 = arith.constant 0 : i32
    %c0_i32_0 = arith.constant 0 : i32
    %c0_i32_1 = arith.constant 0 : i32
    return %c0_i32, %c0_i32_0 : i32, i32
  }
  func.func @transform_13(%arg0: i32) -> (i32, i32) {
    %c0_i32 = arith.constant 0 : i32
    %c0_i32_0 = arith.constant 0 : i32
    %c0_i32_1 = arith.constant 0 : i32
    return %c0_i32, %c0_i32_0 : i32, i32
  }
  func.func @transform_14(%arg0: i32) -> (i32, i32) {
    %c0_i32 = arith.constant 0 : i32
    %c0_i32_0 = arith.constant 0 : i32
    %c0_i32_1 = arith.constant 0 : i32
    return %c0_i32, %c0_i32_0 : i32, i32
  }
  func.func @transform_15(%arg0: i32) -> (i32, i32) {
    %c0_i32 = arith.constant 0 : i32
    %c0_i32_0 = arith.constant 0 : i32
    %c0_i32_1 = arith.constant 0 : i32
    return %c0_i32, %c0_i32_0 : i32, i32
  }
  func.func @transform_16(%arg0: i32) -> (i32, i32) {
    %c0_i32 = arith.constant 0 : i32
    %c0_i32_0 = arith.constant 0 : i32
    %c0_i32_1 = arith.constant 0 : i32
    return %c0_i32, %c0_i32_0 : i32, i32
  }
  func.func @transform_17(%arg0: i32) -> (i32, i32) {
    %c0_i32 = arith.constant 0 : i32
    %c0_i32_0 = arith.constant 0 : i32
    %c0_i32_1 = arith.constant 0 : i32
    return %c0_i32, %c0_i32_0 : i32, i32
  }
  func.func @transform_18(%arg0: i32) -> (i32, i32) {
    %c0_i32 = arith.constant 0 : i32
    %c0_i32_0 = arith.constant 0 : i32
    %c0_i32_1 = arith.constant 0 : i32
    return %c0_i32, %c0_i32_0 : i32, i32
  }
  func.func @transform_19(%arg0: i32) -> (i32, i32) {
    %c0_i32 = arith.constant 0 : i32
    %c0_i32_0 = arith.constant 0 : i32
    %c0_i32_1 = arith.constant 0 : i32
    return %c0_i32, %c0_i32_0 : i32, i32
  }
  func.func @transform_20(%arg0: i32) -> (i32, i32) {
    %c0_i32 = arith.constant 0 : i32
    %c0_i32_0 = arith.constant 0 : i32
    %c0_i32_1 = arith.constant 0 : i32
    return %c0_i32, %c0_i32_0 : i32, i32
  }
}

module attributes {stable_mosaic.version = 11 : i64} {
  func.func @kernel(%arg0: i32, %arg1: memref<32x16xf32, #tpu.memory_space<vmem>>, %arg2: memref<8x32xf32, #tpu.memory_space<vmem>>, %arg3: memref<16x4xf32, #tpu.memory_space<vmem>>, %arg4: memref<64x1xi32, #tpu.memory_space<vmem>>, %arg5: memref<1x64xi32, #tpu.memory_space<vmem>>, %arg6: memref<64x1xf32, #tpu.memory_space<vmem>>, %arg7: memref<16x32xf32, #tpu.memory_space<vmem>>, %arg8: memref<32x32xf32, #tpu.memory_space<vmem>>, %arg9: memref<1x32xf32, #tpu.memory_space<vmem>>, %arg10: memref<1x32xf32, #tpu.memory_space<vmem>>, %arg11: memref<16x32xf32, #tpu.memory_space<vmem>>, %arg12: memref<32x32xf32, #tpu.memory_space<vmem>>, %arg13: memref<32x32xf32, #tpu.memory_space<vmem>>, %arg14: memref<1x32xf32, #tpu.memory_space<vmem>>, %arg15: memref<32x32xf32, #tpu.memory_space<vmem>>, %arg16: memref<1x32xf32, #tpu.memory_space<vmem>>, %arg17: memref<1x32xf32, #tpu.memory_space<vmem>>, %arg18: memref<32x32xf32, #tpu.memory_space<vmem>>, %arg19: memref<32x32xf32, #tpu.memory_space<vmem>>, %arg20: memref<1x32xf32, #tpu.memory_space<vmem>>, %arg21: memref<32x32xf32, #tpu.memory_space<vmem>>) attributes {dimension_semantics = [#tpu.dimension_semantics<arbitrary>], iteration_bounds = array<i64: 1>, scalar_prefetch = 0 : i64, scratch_operands = 0 : i64, tpu.core_type = #tpu.core_type<tc>, window_params = [{pipeline_mode = #tpu.pipeline_mode<synchronous>, transform_indices = @transform_0, window_bounds = array<i64: 32, 16>}, {pipeline_mode = #tpu.pipeline_mode<synchronous>, transform_indices = @transform_1, window_bounds = array<i64: 8, 32>}, {pipeline_mode = #tpu.pipeline_mode<synchronous>, transform_indices = @transform_2, window_bounds = array<i64: 16, 4>}, {pipeline_mode = #tpu.pipeline_mode<synchronous>, transform_indices = @transform_3, window_bounds = array<i64: 64, 1>}, {pipeline_mode = #tpu.pipeline_mode<synchronous>, transform_indices = @transform_4, window_bounds = array<i64: 1, 64>}, {pipeline_mode = #tpu.pipeline_mode<synchronous>, transform_indices = @transform_5, window_bounds = array<i64: 64, 1>}, {pipeline_mode = #tpu.pipeline_mode<synchronous>, transform_indices = @transform_6, window_bounds = array<i64: 16, 32>}, {pipeline_mode = #tpu.pipeline_mode<synchronous>, transform_indices = @transform_7, window_bounds = array<i64: 32, 32>}, {pipeline_mode = #tpu.pipeline_mode<synchronous>, transform_indices = @transform_8, window_bounds = array<i64: 1, 32>}, {pipeline_mode = #tpu.pipeline_mode<synchronous>, transform_indices = @transform_9, window_bounds = array<i64: 1, 32>}, {pipeline_mode = #tpu.pipeline_mode<synchronous>, transform_indices = @transform_10, window_bounds = array<i64: 16, 32>}, {pipeline_mode = #tpu.pipeline_mode<synchronous>, transform_indices = @transform_11, window_bounds = array<i64: 32, 32>}, {pipeline_mode = #tpu.pipeline_mode<synchronous>, transform_indices = @transform_12, window_bounds = array<i64: 32, 32>}, {pipeline_mode = #tpu.pipeline_mode<synchronous>, transform_indices = @transform_13, window_bounds = array<i64: 1, 32>}, {pipeline_mode = #tpu.pipeline_mode<synchronous>, transform_indices = @transform_14, window_bounds = array<i64: 32, 32>}, {pipeline_mode = #tpu.pipeline_mode<synchronous>, transform_indices = @transform_15, window_bounds = array<i64: 1, 32>}, {pipeline_mode = #tpu.pipeline_mode<synchronous>, transform_indices = @transform_16, window_bounds = array<i64: 1, 32>}, {pipeline_mode = #tpu.pipeline_mode<synchronous>, transform_indices = @transform_17, window_bounds = array<i64: 32, 32>}, {pipeline_mode = #tpu.pipeline_mode<synchronous>, transform_indices = @transform_18, window_bounds = array<i64: 32, 32>}, {pipeline_mode = #tpu.pipeline_mode<synchronous>, transform_indices = @transform_19, window_bounds = array<i64: 1, 32>}, {pipeline_mode = #tpu.pipeline_mode<synchronous>, transform_indices = @transform_20, window_bounds = array<i64: 32, 32>}]} {
    %c0 = arith.constant 0 : index
    %c0_0 = arith.constant 0 : index
    %0 = vector.load %arg3[%c0, %c0_0] : memref<16x4xf32, #tpu.memory_space<vmem>>, vector<16x4xf32>
    %c0_1 = arith.constant 0 : index
    %c0_2 = arith.constant 0 : index
    %1 = vector.load %arg2[%c0_1, %c0_2] : memref<8x32xf32, #tpu.memory_space<vmem>>, vector<8x32xf32>
    %2 = vector.extract_strided_slice %1 {offsets = [0, 0], sizes = [4, 32], strides = [1, 1]} : vector<8x32xf32> to vector<4x32xf32>
    %cst = arith.constant dense<0.000000e+00> : vector<16x32xf32>
    %3 = tpu.matmul %0, %2, %cst {dimension_numbers = #tpu.dot_dimension_numbers<[1], [0], [0], [1], [0, 0, 1, 1], [], []>} : vector<16x4xf32>, vector<4x32xf32>, vector<16x32xf32> -> vector<16x32xf32>
    %4 = vector.extract_strided_slice %1 {offsets = [4, 0], sizes = [4, 32], strides = [1, 1]} : vector<8x32xf32> to vector<4x32xf32>
    %cst_3 = arith.constant dense<0.000000e+00> : vector<16x32xf32>
    %5 = tpu.matmul %0, %4, %cst_3 {dimension_numbers = #tpu.dot_dimension_numbers<[1], [0], [0], [1], [0, 0, 1, 1], [], []>} : vector<16x4xf32>, vector<4x32xf32>, vector<16x32xf32> -> vector<16x32xf32>
    %6 = tpu.concatenate %3, %5 in 0 : vector<16x32xf32>, vector<16x32xf32> -> vector<32x32xf32>
    %c0_4 = arith.constant 0 : index
    %c0_5 = arith.constant 0 : index
    %7 = vector.load %arg1[%c0_4, %c0_5] : memref<32x16xf32, #tpu.memory_space<vmem>>, vector<32x16xf32>
    %c0_6 = arith.constant 0 : index
    %c0_7 = arith.constant 0 : index
    %8 = vector.load %arg4[%c0_6, %c0_7] : memref<64x1xi32, #tpu.memory_space<vmem>>, vector<64x1xi32>
    %9 = tpu.iota {dimensions = array<i32: 1>} : vector<64x32xi32>
    %10 = vector.shape_cast %8 : vector<64x1xi32> to vector<64x1xi32>
    %11 = vector.broadcast %10 : vector<64x1xi32> to vector<64x32xi32>
    %12 = arith.cmpi eq, %11, %9 : vector<64x32xi32>
    %13 = arith.extui %12 : vector<64x32xi1> to vector<64x32xi32>
    %14 = arith.sitofp %13 : vector<64x32xi32> to vector<64x32xf32>
    %c0_8 = arith.constant 0 : index
    %c0_9 = arith.constant 0 : index
    %15 = vector.load %arg5[%c0_8, %c0_9] : memref<1x64xi32, #tpu.memory_space<vmem>>, vector<1x64xi32>
    %16 = tpu.iota {dimensions = array<i32: 0>} : vector<32x64xi32>
    %17 = vector.shape_cast %15 : vector<1x64xi32> to vector<1x64xi32>
    %18 = vector.broadcast %17 : vector<1x64xi32> to vector<32x64xi32>
    %19 = arith.cmpi eq, %18, %16 : vector<32x64xi32>
    %20 = arith.extui %19 : vector<32x64xi1> to vector<32x64xi32>
    %21 = arith.sitofp %20 : vector<32x64xi32> to vector<32x64xf32>
    %cst_10 = arith.constant dense<0.000000e+00> : vector<32xf32>
    %22 = vector.multi_reduction <add>, %21, %cst_10 [1] : vector<32x64xf32> to vector<32xf32>
    %23 = vector.shape_cast %22 : vector<32xf32> to vector<32x1xf32>
    %cst_11 = arith.constant 1.000000e+00 : f32
    %24 = vector.broadcast %cst_11 : f32 to vector<32x1xf32>
    %25 = arith.maximumf %23, %24 : vector<32x1xf32>
    %c0_12 = arith.constant 0 : index
    %c0_13 = arith.constant 0 : index
    %26 = vector.load %arg6[%c0_12, %c0_13] : memref<64x1xf32, #tpu.memory_space<vmem>>, vector<64x1xf32>
    %c0_14 = arith.constant 0 : index
    %c0_15 = arith.constant 0 : index
    %27 = vector.load %arg7[%c0_14, %c0_15] : memref<16x32xf32, #tpu.memory_space<vmem>>, vector<16x32xf32>
    %c0_16 = arith.constant 0 : index
    %c0_17 = arith.constant 0 : index
    %28 = vector.load %arg8[%c0_16, %c0_17] : memref<32x32xf32, #tpu.memory_space<vmem>>, vector<32x32xf32>
    %c0_18 = arith.constant 0 : index
    %c0_19 = arith.constant 0 : index
    %29 = vector.load %arg9[%c0_18, %c0_19] : memref<1x32xf32, #tpu.memory_space<vmem>>, vector<1x32xf32>
    %c0_20 = arith.constant 0 : index
    %c0_21 = arith.constant 0 : index
    %30 = vector.load %arg10[%c0_20, %c0_21] : memref<1x32xf32, #tpu.memory_space<vmem>>, vector<1x32xf32>
    %c0_22 = arith.constant 0 : index
    %c0_23 = arith.constant 0 : index
    %31 = vector.load %arg11[%c0_22, %c0_23] : memref<16x32xf32, #tpu.memory_space<vmem>>, vector<16x32xf32>
    %c0_24 = arith.constant 0 : index
    %c0_25 = arith.constant 0 : index
    %32 = vector.load %arg12[%c0_24, %c0_25] : memref<32x32xf32, #tpu.memory_space<vmem>>, vector<32x32xf32>
    %c0_26 = arith.constant 0 : index
    %c0_27 = arith.constant 0 : index
    %33 = vector.load %arg13[%c0_26, %c0_27] : memref<32x32xf32, #tpu.memory_space<vmem>>, vector<32x32xf32>
    %c0_28 = arith.constant 0 : index
    %c0_29 = arith.constant 0 : index
    %34 = vector.load %arg14[%c0_28, %c0_29] : memref<1x32xf32, #tpu.memory_space<vmem>>, vector<1x32xf32>
    %cst_30 = arith.constant dense<0.000000e+00> : vector<64x16xf32>
    %35 = tpu.matmul %14, %7, %cst_30 {dimension_numbers = #tpu.dot_dimension_numbers<[1], [0], [0], [1], [0, 0, 1, 1], [], []>} : vector<64x32xf32>, vector<32x16xf32>, vector<64x16xf32> -> vector<64x16xf32>
    %cst_31 = arith.constant dense<0.000000e+00> : vector<64x32xf32>
    %36 = tpu.matmul %14, %6, %cst_31 {dimension_numbers = #tpu.dot_dimension_numbers<[1], [0], [0], [1], [0, 0, 1, 1], [], []>} : vector<64x32xf32>, vector<32x32xf32>, vector<64x32xf32> -> vector<64x32xf32>
    %cst_32 = arith.constant dense<0.000000e+00> : vector<64x32xf32>
    %37 = tpu.matmul %35, %27, %cst_32 {dimension_numbers = #tpu.dot_dimension_numbers<[1], [0], [0], [1], [0, 0, 1, 1], [], []>} : vector<64x16xf32>, vector<16x32xf32>, vector<64x32xf32> -> vector<64x32xf32>
    %cst_33 = arith.constant dense<0.000000e+00> : vector<64x32xf32>
    %38 = tpu.matmul %36, %28, %cst_33 {dimension_numbers = #tpu.dot_dimension_numbers<[1], [0], [0], [1], [0, 0, 1, 1], [], []>} : vector<64x32xf32>, vector<32x32xf32>, vector<64x32xf32> -> vector<64x32xf32>
    %39 = arith.addf %37, %38 : vector<64x32xf32>
    %40 = vector.broadcast %26 : vector<64x1xf32> to vector<64x32xf32>
    %41 = vector.broadcast %29 : vector<1x32xf32> to vector<64x32xf32>
    %42 = arith.mulf %40, %41 : vector<64x32xf32>
    %43 = arith.addf %39, %42 : vector<64x32xf32>
    %44 = vector.broadcast %30 : vector<1x32xf32> to vector<64x32xf32>
    %45 = arith.addf %43, %44 : vector<64x32xf32>
    %cst_34 = arith.constant 0.000000e+00 : f32
    %46 = vector.broadcast %cst_34 : f32 to vector<64x32xf32>
    %47 = arith.maximumf %45, %46 : vector<64x32xf32>
    %cst_35 = arith.constant dense<0.000000e+00> : vector<32x32xf32>
    %48 = tpu.matmul %21, %47, %cst_35 {dimension_numbers = #tpu.dot_dimension_numbers<[1], [0], [0], [1], [0, 0, 1, 1], [], []>} : vector<32x64xf32>, vector<64x32xf32>, vector<32x32xf32> -> vector<32x32xf32>
    %49 = vector.broadcast %25 : vector<32x1xf32> to vector<32x32xf32>
    %50 = arith.divf %48, %49 : vector<32x32xf32>
    %cst_36 = arith.constant dense<0.000000e+00> : vector<32x32xf32>
    %51 = tpu.matmul %7, %31, %cst_36 {dimension_numbers = #tpu.dot_dimension_numbers<[1], [0], [0], [1], [0, 0, 1, 1], [], []>} : vector<32x16xf32>, vector<16x32xf32>, vector<32x32xf32> -> vector<32x32xf32>
    %cst_37 = arith.constant dense<0.000000e+00> : vector<32x32xf32>
    %52 = tpu.matmul %6, %32, %cst_37 {dimension_numbers = #tpu.dot_dimension_numbers<[1], [0], [0], [1], [0, 0, 1, 1], [], []>} : vector<32x32xf32>, vector<32x32xf32>, vector<32x32xf32> -> vector<32x32xf32>
    %53 = arith.addf %51, %52 : vector<32x32xf32>
    %cst_38 = arith.constant dense<0.000000e+00> : vector<32x32xf32>
    %54 = tpu.matmul %50, %33, %cst_38 {dimension_numbers = #tpu.dot_dimension_numbers<[1], [0], [0], [1], [0, 0, 1, 1], [], []>} : vector<32x32xf32>, vector<32x32xf32>, vector<32x32xf32> -> vector<32x32xf32>
    %55 = arith.addf %53, %54 : vector<32x32xf32>
    %56 = vector.broadcast %34 : vector<1x32xf32> to vector<32x32xf32>
    %57 = arith.addf %55, %56 : vector<32x32xf32>
    %cst_39 = arith.constant 0.000000e+00 : f32
    %58 = vector.broadcast %cst_39 : f32 to vector<32x32xf32>
    %59 = arith.maximumf %57, %58 : vector<32x32xf32>
    %c0_40 = arith.constant 0 : index
    %c0_41 = arith.constant 0 : index
    %60 = vector.load %arg15[%c0_40, %c0_41] : memref<32x32xf32, #tpu.memory_space<vmem>>, vector<32x32xf32>
    %c0_42 = arith.constant 0 : index
    %c0_43 = arith.constant 0 : index
    %61 = vector.load %arg16[%c0_42, %c0_43] : memref<1x32xf32, #tpu.memory_space<vmem>>, vector<1x32xf32>
    %c0_44 = arith.constant 0 : index
    %c0_45 = arith.constant 0 : index
    %62 = vector.load %arg17[%c0_44, %c0_45] : memref<1x32xf32, #tpu.memory_space<vmem>>, vector<1x32xf32>
    %c0_46 = arith.constant 0 : index
    %c0_47 = arith.constant 0 : index
    %63 = vector.load %arg18[%c0_46, %c0_47] : memref<32x32xf32, #tpu.memory_space<vmem>>, vector<32x32xf32>
    %c0_48 = arith.constant 0 : index
    %c0_49 = arith.constant 0 : index
    %64 = vector.load %arg19[%c0_48, %c0_49] : memref<32x32xf32, #tpu.memory_space<vmem>>, vector<32x32xf32>
    %c0_50 = arith.constant 0 : index
    %c0_51 = arith.constant 0 : index
    %65 = vector.load %arg20[%c0_50, %c0_51] : memref<1x32xf32, #tpu.memory_space<vmem>>, vector<1x32xf32>
    %cst_52 = arith.constant dense<0.000000e+00> : vector<64x32xf32>
    %66 = tpu.matmul %14, %59, %cst_52 {dimension_numbers = #tpu.dot_dimension_numbers<[1], [0], [0], [1], [0, 0, 1, 1], [], []>} : vector<64x32xf32>, vector<32x32xf32>, vector<64x32xf32> -> vector<64x32xf32>
    %cst_53 = arith.constant dense<0.000000e+00> : vector<64x32xf32>
    %67 = tpu.matmul %66, %60, %cst_53 {dimension_numbers = #tpu.dot_dimension_numbers<[1], [0], [0], [1], [0, 0, 1, 1], [], []>} : vector<64x32xf32>, vector<32x32xf32>, vector<64x32xf32> -> vector<64x32xf32>
    %68 = vector.broadcast %26 : vector<64x1xf32> to vector<64x32xf32>
    %69 = vector.broadcast %61 : vector<1x32xf32> to vector<64x32xf32>
    %70 = arith.mulf %68, %69 : vector<64x32xf32>
    %71 = arith.addf %67, %70 : vector<64x32xf32>
    %72 = vector.broadcast %62 : vector<1x32xf32> to vector<64x32xf32>
    %73 = arith.addf %71, %72 : vector<64x32xf32>
    %cst_54 = arith.constant 0.000000e+00 : f32
    %74 = vector.broadcast %cst_54 : f32 to vector<64x32xf32>
    %75 = arith.maximumf %73, %74 : vector<64x32xf32>
    %cst_55 = arith.constant dense<0.000000e+00> : vector<32x32xf32>
    %76 = tpu.matmul %21, %75, %cst_55 {dimension_numbers = #tpu.dot_dimension_numbers<[1], [0], [0], [1], [0, 0, 1, 1], [], []>} : vector<32x64xf32>, vector<64x32xf32>, vector<32x32xf32> -> vector<32x32xf32>
    %77 = vector.broadcast %25 : vector<32x1xf32> to vector<32x32xf32>
    %78 = arith.divf %76, %77 : vector<32x32xf32>
    %cst_56 = arith.constant dense<0.000000e+00> : vector<32x32xf32>
    %79 = tpu.matmul %59, %63, %cst_56 {dimension_numbers = #tpu.dot_dimension_numbers<[1], [0], [0], [1], [0, 0, 1, 1], [], []>} : vector<32x32xf32>, vector<32x32xf32>, vector<32x32xf32> -> vector<32x32xf32>
    %cst_57 = arith.constant dense<0.000000e+00> : vector<32x32xf32>
    %80 = tpu.matmul %78, %64, %cst_57 {dimension_numbers = #tpu.dot_dimension_numbers<[1], [0], [0], [1], [0, 0, 1, 1], [], []>} : vector<32x32xf32>, vector<32x32xf32>, vector<32x32xf32> -> vector<32x32xf32>
    %81 = arith.addf %79, %80 : vector<32x32xf32>
    %82 = vector.broadcast %65 : vector<1x32xf32> to vector<32x32xf32>
    %83 = arith.addf %81, %82 : vector<32x32xf32>
    %cst_58 = arith.constant 0.000000e+00 : f32
    %84 = vector.broadcast %cst_58 : f32 to vector<32x32xf32>
    %85 = arith.maximumf %83, %84 : vector<32x32xf32>
    %c0_59 = arith.constant 0 : index
    %c0_60 = arith.constant 0 : index
    %86 = vector.load %arg21[%c0_59, %c0_60] : memref<32x32xf32, #tpu.memory_space<vmem>>, vector<32x32xf32>
    tpu.vector_store %arg21[%c0_59, %c0_60], %85 {strides = array<i32>} : memref<32x32xf32, #tpu.memory_space<vmem>>, vector<32x32xf32>,
    return
  }
  func.func @transform_0(%arg0: i32) -> (i32, i32) {
    %c0_i32 = arith.constant 0 : i32
    %c0_i32_0 = arith.constant 0 : i32
    %c0_i32_1 = arith.constant 0 : i32
    return %c0_i32, %c0_i32_0 : i32, i32
  }
  func.func @transform_1(%arg0: i32) -> (i32, i32) {
    %c0_i32 = arith.constant 0 : i32
    %c0_i32_0 = arith.constant 0 : i32
    %c0_i32_1 = arith.constant 0 : i32
    return %c0_i32, %c0_i32_0 : i32, i32
  }
  func.func @transform_2(%arg0: i32) -> (i32, i32) {
    %c0_i32 = arith.constant 0 : i32
    %c0_i32_0 = arith.constant 0 : i32
    %c0_i32_1 = arith.constant 0 : i32
    return %c0_i32, %c0_i32_0 : i32, i32
  }
  func.func @transform_3(%arg0: i32) -> (i32, i32) {
    %c0_i32 = arith.constant 0 : i32
    %c0_i32_0 = arith.constant 0 : i32
    %c0_i32_1 = arith.constant 0 : i32
    return %c0_i32, %c0_i32_0 : i32, i32
  }
  func.func @transform_4(%arg0: i32) -> (i32, i32) {
    %c0_i32 = arith.constant 0 : i32
    %c0_i32_0 = arith.constant 0 : i32
    %c0_i32_1 = arith.constant 0 : i32
    return %c0_i32, %c0_i32_0 : i32, i32
  }
  func.func @transform_5(%arg0: i32) -> (i32, i32) {
    %c0_i32 = arith.constant 0 : i32
    %c0_i32_0 = arith.constant 0 : i32
    %c0_i32_1 = arith.constant 0 : i32
    return %c0_i32, %c0_i32_0 : i32, i32
  }
  func.func @transform_6(%arg0: i32) -> (i32, i32) {
    %c0_i32 = arith.constant 0 : i32
    %c0_i32_0 = arith.constant 0 : i32
    %c0_i32_1 = arith.constant 0 : i32
    return %c0_i32, %c0_i32_0 : i32, i32
  }
  func.func @transform_7(%arg0: i32) -> (i32, i32) {
    %c0_i32 = arith.constant 0 : i32
    %c0_i32_0 = arith.constant 0 : i32
    %c0_i32_1 = arith.constant 0 : i32
    return %c0_i32, %c0_i32_0 : i32, i32
  }
  func.func @transform_8(%arg0: i32) -> (i32, i32) {
    %c0_i32 = arith.constant 0 : i32
    %c0_i32_0 = arith.constant 0 : i32
    %c0_i32_1 = arith.constant 0 : i32
    return %c0_i32, %c0_i32_0 : i32, i32
  }
  func.func @transform_9(%arg0: i32) -> (i32, i32) {
    %c0_i32 = arith.constant 0 : i32
    %c0_i32_0 = arith.constant 0 : i32
    %c0_i32_1 = arith.constant 0 : i32
    return %c0_i32, %c0_i32_0 : i32, i32
  }
  func.func @transform_10(%arg0: i32) -> (i32, i32) {
    %c0_i32 = arith.constant 0 : i32
    %c0_i32_0 = arith.constant 0 : i32
    %c0_i32_1 = arith.constant 0 : i32
    return %c0_i32, %c0_i32_0 : i32, i32
  }
  func.func @transform_11(%arg0: i32) -> (i32, i32) {
    %c0_i32 = arith.constant 0 : i32
    %c0_i32_0 = arith.constant 0 : i32
    %c0_i32_1 = arith.constant 0 : i32
    return %c0_i32, %c0_i32_0 : i32, i32
  }
  func.func @transform_12(%arg0: i32) -> (i32, i32) {
    %c0_i32 = arith.constant 0 : i32
    %c0_i32_0 = arith.constant 0 : i32
    %c0_i32_1 = arith.constant 0 : i32
    return %c0_i32, %c0_i32_0 : i32, i32
  }
  func.func @transform_13(%arg0: i32) -> (i32, i32) {
    %c0_i32 = arith.constant 0 : i32
    %c0_i32_0 = arith.constant 0 : i32
    %c0_i32_1 = arith.constant 0 : i32
    return %c0_i32, %c0_i32_0 : i32, i32
  }
  func.func @transform_14(%arg0: i32) -> (i32, i32) {
    %c0_i32 = arith.constant 0 : i32
    %c0_i32_0 = arith.constant 0 : i32
    %c0_i32_1 = arith.constant 0 : i32
    return %c0_i32, %c0_i32_0 : i32, i32
  }
  func.func @transform_15(%arg0: i32) -> (i32, i32) {
    %c0_i32 = arith.constant 0 : i32
    %c0_i32_0 = arith.constant 0 : i32
    %c0_i32_1 = arith.constant 0 : i32
    return %c0_i32, %c0_i32_0 : i32, i32
  }
  func.func @transform_16(%arg0: i32) -> (i32, i32) {
    %c0_i32 = arith.constant 0 : i32
    %c0_i32_0 = arith.constant 0 : i32
    %c0_i32_1 = arith.constant 0 : i32
    return %c0_i32, %c0_i32_0 : i32, i32
  }
  func.func @transform_17(%arg0: i32) -> (i32, i32) {
    %c0_i32 = arith.constant 0 : i32
    %c0_i32_0 = arith.constant 0 : i32
    %c0_i32_1 = arith.constant 0 : i32
    return %c0_i32, %c0_i32_0 : i32, i32
  }
  func.func @transform_18(%arg0: i32) -> (i32, i32) {
    %c0_i32 = arith.constant 0 : i32
    %c0_i32_0 = arith.constant 0 : i32
    %c0_i32_1 = arith.constant 0 : i32
    return %c0_i32, %c0_i32_0 : i32, i32
  }
  func.func @transform_19(%arg0: i32) -> (i32, i32) {
    %c0_i32 = arith.constant 0 : i32
    %c0_i32_0 = arith.constant 0 : i32
    %c0_i32_1 = arith.constant 0 : i32
    return %c0_i32, %c0_i32_0 : i32, i32
  }
  func.func @transform_20(%arg0: i32) -> (i32, i32) {
    %c0_i32 = arith.constant 0 : i32
    %c0_i32_0 = arith.constant 0 : i32
    %c0_i32_1 = arith.constant 0 : i32
    return %c0_i32, %c0_i32_0 : i32, i32
  }
}

</mosaic_0001>

<bundles_post_ra>
// kernel: decoder_forward.2
= control target key start
LH: loop header
LB: loop body
LE: loop exit
PB: predicated region body
PF: predicated region fallthrough
CT: control target
= control target key end

     0   :  { %s2360_s0 = inlined_call_operand.vmem [shape: f32[32,32], index: 0, kind: input, shape index: {}]   ;;  %s2361_s1 = inlined_call_operand.vmem [shape: f32[32,16], index: 1, kind: input, shape index: {}]   ;;  %s2362_s2 = inlined_call_operand.vmem [shape: f32[1,16], index: 2, kind: input, shape index: {}]   ;;  %s2363_s3 = inlined_call_operand.vmem [shape: f32[4,16], index: 3, kind: input, shape index: {}]   ;;  %s2364_s4 = inlined_call_operand.vmem [shape: s32[24,1], index: 4, kind: input, shape index: {}]   ;;  %s2365_s5 = inlined_call_operand.vmem [shape: s32[1,24], index: 5, kind: input, shape index: {}]   ;;  %s2366_s6 = inlined_call_operand.vmem [shape: f32[24,8], index: 6, kind: input, shape index: {}]   ;;  %s2367_s7 = inlined_call_operand.vmem [shape: f32[16,32], index: 7, kind: input, shape index: {}]   ;;  %s2368_s8 = inlined_call_operand.hbm [shape: f32[8,32], index: 8, kind: input, shape index: {}]   ;;  %s2369_s9 = inlined_call_operand.hbm [shape: f32[1,32], index: 9, kind: input, shape index: {}]   ;;  %s2370_s10 = inlined_call_operand.vmem [shape: f32[16,32], index: 10, kind: input, shape index: {}]   ;;  %s2371_s11 = inlined_call_operand.vmem [shape: f32[32,32], index: 11, kind: input, shape index: {}]   ;;  %s2372_s12 = inlined_call_operand.hbm [shape: f32[1,32], index: 12, kind: input, shape index: {}]   ;;  %s2373_s13 = inlined_call_operand.vmem [shape: f32[32,32], index: 13, kind: input, shape index: {}]   ;;  %s2374_s14 = inlined_call_operand.vmem [shape: f32[8,32], index: 14, kind: input, shape index: {}]   ;;  %s2375_s15 = inlined_call_operand.hbm [shape: f32[1,32], index: 15, kind: input, shape index: {}]   ;;  %s2376_s16 = inlined_call_operand.vmem [shape: f32[32,32], index: 16, kind: input, shape index: {}]   ;;  %s2377_s17 = inlined_call_operand.vmem [shape: f32[32,32], index: 17, kind: input, shape index: {}]   ;;  %s2378_s18 = inlined_call_operand.hbm [shape: f32[1,32], index: 18, kind: input, shape index: {}]   ;;  %s2379_s19 = inlined_call_operand.vmem [shape: f32[32,16], index: 19, kind: output, shape index: {0}]   ;;  %s2380_s20 = inlined_call_operand.vmem [shape: f32[8,32], index: 20, kind: output, shape index: {1}]  }
   0x1   :  { %2384 = sst [smem:[#allocation13_spill]] %s2360_s0 }
   0x2   :  { %2385 = sst [smem:[#allocation14_spill]] %s2361_s1 }
   0x3   :  { %2386 = sst [smem:[#allocation15_spill]] %s2362_s2 }
   0x4   :  { %2387 = sst [smem:[#allocation16_spill]] %s2363_s3 }
   0x5   :  { %2388 = sst [smem:[#allocation17_spill]] %s2364_s4 }
   0x6   :  { %26 = vsyncpa [#allocation3], 0 }
   0x7   :  { %27 = vsyncpa [#allocation5], 0 }
   0x8   :  { %28 = vsyncpa [#allocation8], 0  ;;  %s1910_s1 = smov [#allocation4]   ;;  %s1911_s23 = smov [#allocation7]  }
   0x9   :  { %s61_s22 = sshll.u32 %s1910_s1, 4  ;;  %s89_s24 = sshll.u32 %s1911_s23, 4  ;;  %s62_s22 = int_to_ptr.vmem [resolvable:$true] %s61_s22  ;;  %s90_s24 = int_to_ptr.vmem [resolvable:$true] %s89_s24 }
   0xa   :  { %s1794_s3 = scalar_lea.hbm %s2369_s9, 16 }
   0xb   :  { %p1795_p0 = scmp.ne.s32.totalorder %s2369_s9, %s1794_s3  ;;  %p1798_p1 = scmp.lt.u32.totalorder %s1794_s3, %s2369_s9 }
   0xd   :  { %p1800_p2 = pnand %p1798_p1, %p1795_p0 }
   0xf   :  { %1803 = shalt.err (!%p1800_p2)
}
  0x10   :  { %s1804_s29 = scalar_lea.vmem %s62_s22, 16  ;;  %s1808_s30 = scalar_lea.vmem %s62_s22, 32 }
  0x11   :  { %p1805_p3 = scmp.ne.s32.totalorder %s62_s22, %s1804_s29  ;;  %p1809_p4 = scmp.lt.s32.totalorder %s62_s22, %s62_s22 }
  0x12   :  { %p1810_p5 = scmp.lt.s32.totalorder %s1808_s30, %s1804_s29 }
  0x14   :  { %p1811_p6 = por %p1810_p5, %p1809_p4 }
  0x16   :  { %p1812_p7 = pnand %p1811_p6, %p1805_p3 }
  0x18   :  { %1815 = shalt.err (!%p1812_p7)
}
  0x19   :  { %64 = dma.hbm_to_vmem [thread:$0]  %s2369_s9, 16, %s62_s22, [#allocation5]  }
  0x1a   :  { %s1816_s2 = scalar_lea.hbm %s2375_s15, 16 }
  0x1b   :  { %p1817_p8 = scmp.ne.s32.totalorder %s2375_s15, %s1816_s2  ;;  %p1820_p9 = scmp.lt.u32.totalorder %s1816_s2, %s2375_s15 }
  0x1d   :  { %p1822_p10 = pnand %p1820_p9, %p1817_p8 }
  0x1f   :  { %1825 = shalt.err (!%p1822_p10)
}
  0x20   :  { %s1826_s28 = scalar_lea.vmem %s90_s24, 16  ;;  %s1830_s4 = scalar_lea.vmem %s90_s24, 32 }
  0x21   :  { %p1827_p11 = scmp.ne.s32.totalorder %s90_s24, %s1826_s28  ;;  %p1831_p12 = scmp.lt.s32.totalorder %s90_s24, %s90_s24 }
  0x22   :  { %p1832_p13 = scmp.lt.s32.totalorder %s1830_s4, %s1826_s28 }
  0x24   :  { %p1833_p0 = por %p1832_p13, %p1831_p12 }
  0x26   :  { %p1834_p1 = pnand %p1833_p0, %p1827_p11 }
  0x28   :  { %1837 = shalt.err (!%p1834_p1)
}
  0x29   :  { %92 = dma.hbm_to_vmem [thread:$0]  %s2375_s15, 16, %s90_s24, [#allocation8]  }
  0x2a   :  { %s1912_s29 = smov [#allocation2]   ;;  %s1913_s0 = smov [#allocation6]  }
  0x2b   :  { %s51_s30 = sshll.u32 %s1912_s29, 4  ;;  %s75_s21 = sshll.u32 %s1913_s0, 4  ;;  %s52_s30 = int_to_ptr.vmem [resolvable:$true] %s51_s30  ;;  %s76_s21 = int_to_ptr.vmem [resolvable:$true] %s75_s21 }
  0x2c   :  { %s1838_s2 = scalar_lea.hbm %s2368_s8, 128 }
  0x2d   :  { %p1839_p2 = scmp.ne.s32.totalorder %s2368_s8, %s1838_s2  ;;  %p1842_p3 = scmp.lt.u32.totalorder %s1838_s2, %s2368_s8 }
  0x2f   :  { %p1844_p4 = pnand %p1842_p3, %p1839_p2 }
  0x31   :  { %1847 = shalt.err (!%p1844_p4)
}
  0x32   :  { %s1848_s15 = scalar_lea.vmem %s52_s30, 128  ;;  %p1853_p6 = scmp.lt.s32.totalorder %s52_s30, %s52_s30 }
  0x33   :  { %p1849_p5 = scmp.ne.s32.totalorder %s52_s30, %s1848_s15  ;;  %p1854_p7 = scmp.lt.s32.totalorder %s1848_s15, %s1848_s15 }
  0x35   :  { %p1855_p8 = por %p1854_p7, %p1853_p6 }
  0x37   :  { %p1856_p9 = pnand %p1855_p8, %p1849_p5 }
  0x39   :  { %1859 = shalt.err (!%p1856_p9)
}
  0x3a   :  { %54 = dma.hbm_to_vmem [thread:$0]  %s2368_s8, 128, %s52_s30, [#allocation3]  }
  0x3b   :  { %s1860_s22 = scalar_lea.hbm %s2372_s12, 16 }
  0x3c   :  { %p1861_p10 = scmp.ne.s32.totalorder %s2372_s12, %s1860_s22  ;;  %p1864_p11 = scmp.lt.u32.totalorder %s1860_s22, %s2372_s12 }
  0x3e   :  { %p1866_p12 = pnand %p1864_p11, %p1861_p10 }
  0x40   :  { %1869 = shalt.err (!%p1866_p12)
}
  0x41   :  { %s1870_s2 = scalar_lea.vmem %s76_s21, 16  ;;  %s1874_s25 = scalar_lea.vmem %s76_s21, 32 }
  0x42   :  { %p1871_p13 = scmp.ne.s32.totalorder %s76_s21, %s1870_s2  ;;  %p1875_p0 = scmp.lt.s32.totalorder %s76_s21, %s76_s21 }
  0x43   :  { %p1876_p1 = scmp.lt.s32.totalorder %s1874_s25, %s1870_s2 }
  0x45   :  { %p1877_p2 = por %p1876_p1, %p1875_p0 }
  0x47   :  { %p1878_p3 = pnand %p1877_p2, %p1871_p13 }
  0x49   :  { %1881 = shalt.err (!%p1878_p3)
}
  0x4a   :  { %78 = dma.hbm_to_vmem [thread:$0]  %s2372_s12, 16, %s76_s21, [#allocation5]  }
  0x4b   :  { %s1914_s3 = smov [#allocation9]   ;;  %s1882_s24 = scalar_lea.hbm %s2378_s18, 16 }
  0x4c   :  { %s103_s26 = sshll.u32 %s1914_s3, 4  ;;  %p1883_p4 = scmp.ne.s32.totalorder %s2378_s18, %s1882_s24  ;;  %s104_s26 = int_to_ptr.vmem [resolvable:$true] %s103_s26 }
  0x4d   :  { %p1886_p5 = scmp.lt.u32.totalorder %s1882_s24, %s2378_s18 }
  0x4f   :  { %p1888_p6 = pnand %p1886_p5, %p1883_p4 }
  0x51   :  { %1891 = shalt.err (!%p1888_p6)
}
  0x52   :  { %s1892_s29 = scalar_lea.vmem %s104_s26, 16  ;;  %s1896_s12 = scalar_lea.vmem %s104_s26, 32 }
  0x53   :  { %p1893_p7 = scmp.ne.s32.totalorder %s104_s26, %s1892_s29  ;;  %p1897_p8 = scmp.lt.s32.totalorder %s104_s26, %s104_s26 }
  0x54   :  { %p1898_p9 = scmp.lt.s32.totalorder %s1896_s12, %s1892_s29 }
  0x56   :  { %p1899_p10 = por %p1898_p9, %p1897_p8 }
  0x58   :  { %p1900_p11 = pnand %p1899_p10, %p1893_p7 }
  0x5a   :  { %1903 = shalt.err (!%p1900_p11)
}
  0x5b   :  { %106 = dma.hbm_to_vmem [thread:$0]  %s2378_s18, 16, %s104_s26, [#allocation8]  }
  0x5c   :  { %1904 = dma.done.wait [#allocation3], 128  }
  0x5d   :  { %1905 = vsyncadd [#allocation3], 4294967168 }
  0x5e   :  { %1906 = dma.done.wait [#allocation5], 32  }
  0x5f   :  { %1907 = vsyncadd [#allocation5], 4294967264 }
  0x60   :  { %1908 = dma.done.wait [#allocation8], 32  }
  0x61   :  { %1909 = vsyncadd [#allocation8], 4294967264  ;;  %vm137_vm0 = vcmask 261120   ;;  %s2389_s2 = sld [smem:[#allocation14_spill]]  ;;  %s2390_s24 = sld [smem:[#allocation13_spill]]  ;;  %v1915_v10 = vmov 0.0|0.0   ;;  %v392_v29 = vlaneseq }
  0x62   :  { %1739 = vmatprep.subr.bf16.mxu1 %v1915_v10  ;;  %vm1916_vm1 = vmmov 0   ;;  %v1917_v11 = vmov 0.0   ;;  %s2391_s1 = sld [smem:[#allocation17_spill]]  ;;  %v1918_v14 = vmov 0   ;;  %s2392_s18 = sld [smem:[#allocation15_spill]]  ;;  %vm235_vm2 = vcmask 130048  }
  0x63   :  { %1589 = vmatprep.mubr.msk.f32.mxu1 %vm1916_vm1, %v1917_v11  ;;  %1790 = vset.pattern.permute.xlu0 %v1918_v14  ;;  %s2393_s9 = sld [smem:[#allocation16_spill]]  ;;  %v432_v28 = vld [vmem:[#allocation2] sm:$0xff]  ;;  %v393_v30 = vand.u32 127, %v392_v29  ;;  %v431_v35 = vld [vmem:[%s2367_s7 + $0x8] sm:$0xff]  ;;  %vm387_vm4 = vcmask 1043456   ;;  %vm441_vm5 = vcmask 64512  }
  0x64   :  { %1791 = vset.pattern.permute.xlu1 %v1918_v14  ;;  %v430_v34 = vld [vmem:[%s2367_s7] sm:$0xff]  ;;  %v2200_v47 = vld [vmem:[%s2366_s6 + $0x8] sm:$0xff]  ;;  %v2209_v48 = vld [vmem:[%s2366_s6 + $0x10] sm:$0xff]  ;;  %vm422_vm9 = vcmask 195584  }
  0x65   :  { %v1746_v41 = vpack.c.bf16 %v431_v35, %v430_v34  ;;  %v2191_v46 = vld [vmem:[%s2366_s6] sm:$0xff]  ;;  %v435_v50 = vld [vmem:[%s2370_s10 + $0x8] sm:$0xff] }
  0x66   :  { %v434_v49 = vld [vmem:[%s2370_s10] sm:$0xff] }
  0x67   :  { %v126_v0 = vld [vmem:[%s2389_s2] sm:$0xff]  ;;  %v127_v1 = vld [vmem:[%s2389_s2 + $0x8] sm:$0xff]  ;;  %v128_v2 = vld [vmem:[%s2389_s2 + $0x10] sm:$0xff]  ;;  %v1758_v51 = vpack.c.bf16 %v435_v50, %v434_v49 }
  0x68   :  { %v1731_v3 = vpack.c.bf16 %v127_v1, %v126_v0  ;;  %v129_v4 = vld [vmem:[%s2389_s2 + $0x18] sm:$0xff]  ;;  %v122_v5 = vld [vmem:[%s2390_s24] sm:$0xff]  ;;  %v123_v7 = vld [vmem:[%s2390_s24 + $0x8] sm:$0xff]  ;;  %v414_v0 = vshrl.u32 %v392_v29, 7 }
  0x69   :  { %v1735_v6 = vpack.c.bf16 %v129_v4, %v128_v2  ;;  %1579 = vmatprep.mubr.msk.f32.mxu0 %vm137_vm0, %v122_v5  ;;  %v124_v8 = vld [vmem:[%s2390_s24 + $0x10] sm:$0xff]  ;;  %v125_v9 = vld [vmem:[%s2390_s24 + $0x18] sm:$0xff]  ;;  %v389_v12 = vld [vmem:[%s2391_s1] sm:$0xff] }
  0x6a   :  { %1732 = vmatprep.subr.bf16.mxu0 %v1731_v3  ;;  %v391_v13 = vld [vmem:[%s2391_s1 + $0x10] sm:$0xff]  ;;  %395 = vperm.xlu0 %1790, %v389_v12   ;;  %v390_v15 = vld [vmem:[%s2391_s1 + $0x8] sm:$0xff]  ;;  %v1463_v16 = vld [vmem:[%s2392_s18] ss:$0 sm:$0xff] }
  0x6b   :  { %1734 = vmatpush3.bf16.msra.mxu0 %v1731_v3  ;;  %401 = vperm.xlu1 %1791, %v391_v13   ;;  %v240_v26 = vld [vmem:[%s2393_s9] sm:$0xf]  ;;  %v439_v29 = vld [vmem:[%s2371_s11 + $0x18] sm:$0xff] }
  0x6c   :  { %1736 = vmatprep.subr.bf16.mxu0 %v1735_v6  ;;  %v1473_v1 = vld [vmem:[%s2365_s5] ss:$0 sm:$0xff] }
  0x6d   :  { %vm419_vm8 = vcmp.eq.s32.totalorder %v1473_v1, %v414_v0 }
  0x6e   :  { %398 = vperm.xlu0 %1790, %v390_v15   ;;  %v2239_v2 = vsel %vm419_vm8, 1.0, %v1917_v11 }
  0x6f   :  { %1738 = vmatpush3.bf16.msra.mxu0 %v1735_v6  ;;  %v423_v3 = vsel %vm422_vm9, %v2239_v2, 0.0 }
  0x70   :  { %1610 = vmatprep.subr.mxu0 %v1917_v11 }
  0x72   :  { %1580 = vmatmul.mubr.msk.f32.vlgmr.msra.gmra.mrb[0].mxu0 %vm137_vm0, %v123_v7  ;;  %v1484_v7 = vld [vmem:[#allocation4] ss:$0 sm:$0xff] }
  0x73   :  { %1582 = vmatprep.mubr.msk.f32.mxu0 %vm137_vm0, %v124_v8  ;;  %1611 = vmatpush3.msra.mxu0 %v432_v28  ;;  %v438_v28 = vld [vmem:[%s2371_s11 + $0x10] sm:$0xff] }
  0x74   :  { %1748 = vmatprep.subr.bf16.mxu0 %v1915_v10 }
  0x76   :  { %1583 = vmatmul.mubr.msk.f32.gmra.mrb[2].mxu0 %vm137_vm0, %v125_v9 }
  0x77   :  { %1612 = vmatprep.mubr.msk.f32.mxu0 %vm1916_vm1, %v1917_v11 }
  0x7a   :  { %1613 = vmatmul.mubr.msk.f32.vlgmr.msra.gmra.mrb[4].mxu0 %vm441_vm5, %v2191_v46 }
  0x7b   :  { %1615 = vmatprep.mubr.msk.f32.mxu0 %vm1916_vm1, %v1917_v11 }
  0x7e   :  { %1616 = vmatmul.mubr.msk.f32.gmra.mrb[6].mxu0 %vm441_vm5, %v2200_v47 }
  0x7f   :  { %1618 = vmatprep.mubr.msk.f32.mxu0 %vm1916_vm1, %v1917_v11 }
  0x82   :  { %1619 = vmatmul.mubr.msk.f32.gmra.mrb[8].mxu0 %vm441_vm5, %v2209_v48 }
  0x83   :  { %1640 = vmatprep.mubr.msk.f32.mxu0 %vm1916_vm1, %v1917_v11 }
  0x8f   :  { %424 = vadd.xlane.f32.xlu1 %v423_v3 }
  0xe9   :  { %v396_v32 = vpop.permute.xlu0 %395 }
  0xea   :  { %vm403_vm3 = vcmp.eq.s32.totalorder %v396_v32, %v393_v30  ;;  %v402_v43 = vpop.permute.xlu1 %401 }
  0xeb   :  { %v2166_v39 = vsel %vm403_vm3, 1.0, %v1917_v11  ;;  %vm405_vm7 = vcmp.eq.s32.totalorder %v402_v43, %v393_v30  ;;  %v950_v43 = vld [vmem:[%s2373_s13] sm:$0xff] }
  0xec   :  { %v2180_v45 = vsel %vm405_vm7, 1.0, %v1917_v11 }
  0xed   :  { %v399_v40 = vpop.permute.xlu0 %398 }
  0xee   :  { %vm404_vm6 = vcmp.eq.s32.totalorder %v399_v40, %v393_v30  ;;  %v1755_v30 = vpack.c.bf16 %v439_v29, %v438_v28  ;;  %v962_v29 = vld [vmem:[%s2377_s17 + $0x10] sm:$0xff] }
  0xef   :  { %v2175_v44 = vsel %vm404_vm6, 1.0, %v1917_v11 }
 0x145   :  { %v1581_v17 = vpop.f32.mrb[0].mxu0 }
 0x146   :  { %v222_v18 = vadd.f32 %v1581_v17, %v1463_v16  ;;  %v216_v19 = vpop.f32.mrb[1].mxu0 }
 0x147   :  { %v217_v20 = vadd.f32 %v1463_v16, %v216_v19 }
 0x148   :  { %237 = vst.msk [vmem:[%s2379_s19 + $0x8] sm:$0xff] %vm235_vm2, %v222_v18 }
 0x149   :  { %236 = vst.msk [vmem:[%s2379_s19] sm:$0xff] %vm235_vm2, %v217_v20  ;;  %v1584_v21 = vpop.f32.mrb[2].mxu0  ;;  %v1740_v22 = vpack.c.bf16 %v222_v18, %v217_v20 }
 0x14a   :  { %v232_v23 = vadd.f32 %v1584_v21, %v1463_v16  ;;  %v226_v24 = vpop.f32.mrb[3].mxu0 }
 0x14b   :  { %v227_v25 = vadd.f32 %v1463_v16, %v226_v24  ;;  %1741 = vmatpush3.bf16.msra.mxu1 %v1740_v22  ;;  %v437_v24 = vld [vmem:[%s2371_s11 + $0x8] sm:$0xff] }
 0x14c   :  { %239 = vst.msk [vmem:[%s2379_s19 + $0x18] sm:$0xff] %vm235_vm2, %v232_v23  ;;  %1742 = vmatprep.subr.bf16.mxu1 %v1915_v10 }
 0x14d   :  { %238 = vst.msk [vmem:[%s2379_s19 + $0x10] sm:$0xff] %vm235_vm2, %v227_v25  ;;  %v1743_v27 = vpack.c.bf16 %v232_v23, %v227_v25  ;;  %v606_v58 = vpop.f32.mrb[4].mxu0  ;;  %v436_v23 = vld [vmem:[%s2371_s11] sm:$0xff] }
 0x14e   :  { %1590 = vmatmul.mubr.msk.f32.vlgmr.msra.gmra.mrb[0].mxu1 %vm235_vm2, %v240_v26  ;;  %v1614_v59 = vpop.f32.mrb[5].mxu0 }
 0x14f   :  { %1744 = vmatpush3.bf16.msra.mxu1 %v1743_v27  ;;  %1596 = vmatprep.mubr.msk.f32.mxu1 %vm1916_vm1, %v1917_v11  ;;  %v1752_v27 = vpack.c.bf16 %v437_v24, %v436_v23  ;;  %v960_v24 = vld [vmem:[%s2377_s17] sm:$0xff] }
 0x150   :  { %1599 = vmatprep.subr.mxu1 %v1917_v11 }
 0x151   :  { %v611_v60 = vpop.f32.mrb[6].mxu0 }
 0x152   :  { %1597 = vmatmul.mubr.msk.f32.vlgmr.msra.gmra.mrb[2].mxu1 %vm235_vm2, %v240_v26  ;;  %v1617_v61 = vpop.f32.mrb[7].mxu0 }
 0x153   :  { %1601 = vmatprep.mubr.msk.f32.mxu1 %vm1916_vm1, %v1917_v11 }
 0x155   :  { %v616_v62 = vpop.f32.mrb[8].mxu0 }
 0x156   :  { %v1620_v63 = vpop.f32.mrb[9].mxu0 }
 0x221   :  { %v310_v31 = vpop.f32.mrb[0].mxu1 }
 0x222   :  { %v1591_v33 = vpop.f32.mrb[1].mxu1 }
 0x225   :  { %v380_v36 = vpop.f32.mrb[2].mxu1 }
 0x226   :  { %v385_v37 = vrot.slane %v380_v36, 4  ;;  %v1598_v38 = vpop.f32.mrb[3].mxu1 }
 0x227   :  { %v1488_v38 = vld [vmem:[#allocation6] ss:$0 sm:$0xff] }
 0x228   :  { %v388_v42 = vsel %vm387_vm4, %v310_v31, %v385_v37  ;;  %v425_v31 = vpop.xlane.xlu1 %424  ;;  %v954_v37 = vld [vmem:[%s2374_s14] sm:$0xff] }
 0x229   :  { %1600 = vmatpush3.msra.mxu1 %v388_v42  ;;  %v426_v32 = vmax.f32 %v425_v31, 1.0 }
 0x22a   :  { %1602 = vmatmul.mubr.msk.f32.vlgmr.msra.gmra.mrb[4].mxu1 %vm441_vm5, %v2166_v39  ;;  %1745 = vmatprep.subr.bf16.mxu1 %v1915_v10 }
 0x22b   :  { %1604 = vmatprep.mubr.msk.f32.mxu1 %vm1916_vm1, %v1917_v11  ;;  %1747 = vmatpush3.bf16.msra.mxu1 %v1746_v41  ;;  %1792 = vrcp.f32 %v426_v32 }
 0x22c   :  { %1757 = vmatprep.subr.bf16.mxu1 %v1915_v10 }
 0x22e   :  { %1605 = vmatmul.mubr.msk.f32.gmra.mrb[6].mxu1 %vm441_vm5, %v2175_v44 }
 0x22f   :  { %1607 = vmatprep.mubr.msk.f32.mxu1 %vm1916_vm1, %v1917_v11 }
 0x232   :  { %1608 = vmatmul.mubr.msk.f32.gmra.mrb[8].mxu1 %vm441_vm5, %v2180_v45 }
 0x233   :  { %1625 = vmatprep.mubr.msk.f32.mxu1 %vm1916_vm1, %v1917_v11 }
 0x235   :  { %v2263_v33 = vpop.eup %1792 }
 0x2fd   :  { %v517_v52 = vpop.f32.mrb[4].mxu1 }
 0x2fe   :  { %v1603_v53 = vpop.f32.mrb[5].mxu1  ;;  %1626 = vmatmul.mubr.msk.f32.vlgmr.msra.gmra.mrb[10].mxu1 %vm235_vm2, %v517_v52 }
 0x2ff   :  { %1628 = vmatprep.mubr.msk.f32.mxu1 %vm1916_vm1, %v1917_v11  ;;  %1759 = vmatpush3.bf16.msra.mxu1 %v1758_v51  ;;  %v953_v51 = vld [vmem:[%s2373_s13 + $0x18] sm:$0xff] }
 0x300   :  { %1672 = vmatprep.subr.mxu1 %v1917_v11 }
 0x301   :  { %v522_v54 = vpop.f32.mrb[6].mxu1 }
 0x302   :  { %v1606_v55 = vpop.f32.mrb[7].mxu1  ;;  %1629 = vmatmul.mubr.msk.f32.gmra.mrb[12].mxu1 %vm235_vm2, %v522_v54  ;;  %v956_v54 = vld [vmem:[%s2376_s16] sm:$0xff] }
 0x303   :  { %1631 = vmatprep.mubr.msk.f32.mxu1 %vm1916_vm1, %v1917_v11 }
 0x305   :  { %v527_v56 = vpop.f32.mrb[8].mxu1 }
 0x306   :  { %1632 = vmatmul.mubr.msk.f32.gmra.mrb[14].mxu1 %vm235_vm2, %v527_v56  ;;  %v1609_v57 = vpop.f32.mrb[9].mxu1  ;;  %v958_v56 = vld [vmem:[%s2376_s16 + $0x10] sm:$0xff] }
 0x307   :  { %1658 = vmatprep.mubr.msk.f32.mxu1 %vm1916_vm1, %v1917_v11 }
 0x30a   :  { %1659 = vmatmul.mubr.msk.f32.vlgmr.msra.gmra.mrb[16].mxu1 %vm235_vm2, %v388_v42 }
 0x30b   :  { %1674 = vmatprep.mubr.msk.f32.mxu1 %vm1916_vm1, %v1917_v11  ;;  %1673 = vmatpush3.msra.mxu1 %v954_v37 }
 0x30c   :  { %1766 = vmatprep.subr.bf16.mxu1 %v1915_v10 }
 0x30e   :  { %1675 = vmatmul.mubr.msk.f32.vlgmr.msra.gmra.mrb[18].mxu1 %vm441_vm5, %v2191_v46  ;;  %v951_v46 = vld [vmem:[%s2373_s13 + $0x8] sm:$0xff] }
 0x30f   :  { %1677 = vmatprep.mubr.msk.f32.mxu1 %vm1916_vm1, %v1917_v11  ;;  %v1761_v50 = vpack.c.bf16 %v951_v46, %v950_v43 }
 0x312   :  { %1678 = vmatmul.mubr.msk.f32.gmra.mrb[20].mxu1 %vm441_vm5, %v2200_v47 }
 0x313   :  { %1680 = vmatprep.mubr.msk.f32.mxu1 %vm1916_vm1, %v1917_v11 }
 0x316   :  { %1681 = vmatmul.mubr.msk.f32.gmra.mrb[22].mxu1 %vm441_vm5, %v2209_v48  ;;  %v952_v48 = vld [vmem:[%s2373_s13 + $0x10] sm:$0xff] }
 0x317   :  { %1706 = vmatprep.mubr.msk.f32.mxu1 %vm1916_vm1, %v1917_v11  ;;  %v1764_v52 = vpack.c.bf16 %v953_v51, %v952_v48 }
 0x3d1   :  { %v695_v4 = vpop.f32.mrb[10].mxu1 }
 0x3d2   :  { %v696_v5 = vadd.f32 %v695_v4, %v606_v58  ;;  %v1627_v6 = vpop.f32.mrb[11].mxu1 }
 0x3d4   :  { %v715_v9 = vadd.f32 %v1484_v7, %v696_v5 }
 0x3d5   :  { %v700_v8 = vpop.f32.mrb[12].mxu1 }
 0x3d6   :  { %v701_v12 = vadd.f32 %v700_v8, %v611_v60  ;;  %v1630_v13 = vpop.f32.mrb[13].mxu1  ;;  %v718_v16 = vmax.f32 %v715_v9, 0.0  ;;  %v1498_v8 = vld [vmem:[#allocation7] ss:$0 sm:$0xff] }
 0x3d8   :  { %v716_v14 = vadd.f32 %v1484_v7, %v701_v12 }
 0x3d9   :  { %v705_v15 = vpop.f32.mrb[14].mxu1 }
 0x3da   :  { %v719_v17 = vmax.f32 %v716_v14, 0.0  ;;  %v706_v18 = vadd.f32 %v705_v15, %v616_v62  ;;  %v1633_v19 = vpop.f32.mrb[15].mxu1 }
 0x3dc   :  { %v1749_v20 = vpack.c.bf16 %v719_v17, %v718_v16  ;;  %v717_v21 = vadd.f32 %v1484_v7, %v706_v18 }
 0x3dd   :  { %v938_v22 = vpop.f32.mrb[16].mxu1 }
 0x3de   :  { %v720_v25 = vmax.f32 %v717_v21, 0.0  ;;  %1750 = vmatpush3.bf16.msra.mxu0 %v1749_v20  ;;  %v1660_v26 = vpop.f32.mrb[17].mxu1 }
 0x3df   :  { %1638 = vmatprep.subr.mxu0 %v1917_v11 }
 0x3e2   :  { %1639 = vmatpush3.msra.mxu0 %v720_v25  ;;  %v961_v25 = vld [vmem:[%s2377_s17 + $0x8] sm:$0xff] }
 0x3e3   :  { %1641 = vmatmul.mubr.msk.f32.vlgmr.msra.gmra.mrb[10].mxu0 %vm422_vm9, %v2239_v2  ;;  %1751 = vmatprep.subr.bf16.mxu0 %v1915_v10  ;;  %v1770_v28 = vpack.c.bf16 %v961_v25, %v960_v24 }
 0x3e4   :  { %1753 = vmatpush3.bf16.msra.mxu0 %v1752_v27  ;;  %1651 = vmatprep.mubr.msk.f32.mxu0 %vm1916_vm1, %v1917_v11 }
 0x3e5   :  { %1754 = vmatprep.subr.bf16.mxu0 %v1915_v10 }
 0x3e8   :  { %1756 = vmatpush3.bf16.msra.mxu0 %v1755_v30  ;;  %v963_v30 = vld [vmem:[%s2377_s17 + $0x18] sm:$0xff] }
 0x3e9   :  { %1661 = vmatprep.subr.mxu0 %v1917_v11  ;;  %v1773_v31 = vpack.c.bf16 %v963_v30, %v962_v29 }
 0x4b6   :  { %v790_v34 = vpop.f32.mrb[10].mxu0 }
 0x4b7   :  { %v795_v35 = vmul.f32 %v2263_v33, %v790_v34  ;;  %v1642_v36 = vpop.f32.mrb[11].mxu0 }
 0x4b9   :  { %1652 = vmatmul.mubr.msk.f32.vlgmr.msra.gmra.mrb[12].mxu0 %vm137_vm0, %v795_v35  ;;  %v1502_v35 = vld [vmem:[#allocation9] ss:$0 sm:$0xff] }
 0x4ba   :  { %1663 = vmatprep.mubr.msk.f32.mxu0 %vm1916_vm1, %v1917_v11 }
 0x58c   :  { %v865_v40 = vpop.f32.mrb[12].mxu0 }
 0x58d   :  { %v939_v41 = vadd.f32 %v938_v22, %v865_v40  ;;  %v1653_v42 = vpop.f32.mrb[13].mxu0 }
 0x58f   :  { %v948_v47 = vadd.f32 %v1488_v38, %v939_v41 }
 0x591   :  { %v949_v49 = vmax.f32 %v948_v47, 0.0 }
 0x593   :  { %1662 = vmatpush3.msra.mxu0 %v949_v49 }
 0x594   :  { %1664 = vmatmul.mubr.msk.f32.vlgmr.msra.gmra.mrb[14].mxu0 %vm441_vm5, %v2166_v39  ;;  %1760 = vmatprep.subr.bf16.mxu0 %v1915_v10  ;;  %v1111_v39 = vpop.f32.mrb[18].mxu1 }
 0x595   :  { %1666 = vmatprep.mubr.msk.f32.mxu0 %vm1916_vm1, %v1917_v11  ;;  %1762 = vmatpush3.bf16.msra.mxu0 %v1761_v50  ;;  %v1676_v53 = vpop.f32.mrb[19].mxu1 }
 0x596   :  { %1763 = vmatprep.subr.bf16.mxu0 %v1915_v10  ;;  %v1116_v0 = vpop.f32.mrb[20].mxu1 }
 0x597   :  { %v1679_v1 = vpop.f32.mrb[21].mxu1 }
 0x598   :  { %1667 = vmatmul.mubr.msk.f32.gmra.mrb[16].mxu0 %vm441_vm5, %v2175_v44  ;;  %v957_v44 = vld [vmem:[%s2376_s16 + $0x8] sm:$0xff]  ;;  %v1121_v3 = vpop.f32.mrb[22].mxu1 }
 0x599   :  { %1669 = vmatprep.mubr.msk.f32.mxu0 %vm1916_vm1, %v1917_v11  ;;  %1765 = vmatpush3.bf16.msra.mxu0 %v1764_v52  ;;  %v1776_v55 = vpack.c.bf16 %v957_v44, %v956_v54  ;;  %v1682_v4 = vpop.f32.mrb[23].mxu1 }
 0x59a   :  { %1775 = vmatprep.subr.bf16.mxu0 %v1915_v10 }
 0x59c   :  { %1670 = vmatmul.mubr.msk.f32.gmra.mrb[18].mxu0 %vm441_vm5, %v2180_v45  ;;  %v959_v45 = vld [vmem:[%s2376_s16 + $0x18] sm:$0xff] }
 0x59d   :  { %1691 = vmatprep.mubr.msk.f32.mxu0 %vm1916_vm1, %v1917_v11  ;;  %v1779_v59 = vpack.c.bf16 %v959_v45, %v958_v56 }
 0x667   :  { %v1031_v57 = vpop.f32.mrb[14].mxu0 }
 0x668   :  { %v1665_v58 = vpop.f32.mrb[15].mxu0  ;;  %1692 = vmatmul.mubr.msk.f32.vlgmr.msra.gmra.mrb[20].mxu0 %vm137_vm0, %v1031_v57 }
 0x669   :  { %1694 = vmatprep.mubr.msk.f32.mxu0 %vm1916_vm1, %v1917_v11  ;;  %1777 = vmatpush3.bf16.msra.mxu0 %v1776_v55 }
 0x66a   :  { %1778 = vmatprep.subr.bf16.mxu0 %v1915_v10 }
 0x66b   :  { %v1036_v60 = vpop.f32.mrb[16].mxu0 }
 0x66c   :  { %v1668_v61 = vpop.f32.mrb[17].mxu0  ;;  %1695 = vmatmul.mubr.msk.f32.gmra.mrb[22].mxu0 %vm137_vm0, %v1036_v60 }
 0x66d   :  { %1697 = vmatprep.mubr.msk.f32.mxu0 %vm1916_vm1, %v1917_v11  ;;  %1780 = vmatpush3.bf16.msra.mxu0 %v1779_v59 }
 0x66f   :  { %v1041_v62 = vpop.f32.mrb[18].mxu0 }
 0x670   :  { %v1671_v63 = vpop.f32.mrb[19].mxu0  ;;  %1698 = vmatmul.mubr.msk.f32.gmra.mrb[24].mxu0 %vm137_vm0, %v1041_v62 }
 0x671   :  { %1728 = vmatprep.mubr.msk.f32.mxu0 %vm1916_vm1, %v1917_v11 }
 0x674   :  { %1729 = vmatmul.mubr.msk.f32.vlgmr.msra.gmra.mrb[26].mxu0 %vm137_vm0, %v949_v49 }
 0x73b   :  { %v1200_v5 = vpop.f32.mrb[20].mxu0 }
 0x73c   :  { %v1201_v6 = vadd.f32 %v1200_v5, %v1111_v39  ;;  %v1693_v7 = vpop.f32.mrb[21].mxu0 }
 0x73e   :  { %v1220_v12 = vadd.f32 %v1498_v8, %v1201_v6 }
 0x73f   :  { %v1205_v9 = vpop.f32.mrb[22].mxu0 }
 0x740   :  { %v1206_v13 = vadd.f32 %v1205_v9, %v1116_v0  ;;  %v1696_v14 = vpop.f32.mrb[23].mxu0  ;;  %v1223_v17 = vmax.f32 %v1220_v12, 0.0 }
 0x742   :  { %v1221_v15 = vadd.f32 %v1498_v8, %v1206_v13 }
 0x743   :  { %v1210_v16 = vpop.f32.mrb[24].mxu0 }
 0x744   :  { %v1224_v18 = vmax.f32 %v1221_v15, 0.0  ;;  %v1211_v19 = vadd.f32 %v1210_v16, %v1121_v3  ;;  %v1699_v20 = vpop.f32.mrb[25].mxu0 }
 0x746   :  { %v1767_v21 = vpack.c.bf16 %v1224_v18, %v1223_v17  ;;  %v1222_v22 = vadd.f32 %v1498_v8, %v1211_v19 }
 0x747   :  { %v1439_v23 = vpop.f32.mrb[26].mxu0 }
 0x748   :  { %1768 = vmatpush3.bf16.msra.mxu1 %v1767_v21  ;;  %v1730_v26 = vpop.f32.mrb[27].mxu0  ;;  %v1225_v27 = vmax.f32 %v1222_v22, 0.0 }
 0x749   :  { %1704 = vmatprep.subr.mxu1 %v1917_v11 }
 0x74c   :  { %1705 = vmatpush3.msra.mxu1 %v1225_v27 }
 0x74d   :  { %1707 = vmatmul.mubr.msk.f32.vlgmr.msra.gmra.mrb[24].mxu1 %vm422_vm9, %v2239_v2  ;;  %1769 = vmatprep.subr.bf16.mxu1 %v1915_v10 }
 0x74e   :  { %1771 = vmatpush3.bf16.msra.mxu1 %v1770_v28  ;;  %1717 = vmatprep.mubr.msk.f32.mxu1 %vm1916_vm1, %v1917_v11 }
 0x74f   :  { %1772 = vmatprep.subr.bf16.mxu1 %v1915_v10 }
 0x752   :  { %1774 = vmatpush3.bf16.msra.mxu1 %v1773_v31 }
 0x820   :  { %v1292_v32 = vpop.f32.mrb[24].mxu1 }
 0x821   :  { %v1296_v2 = vmul.f32 %v2263_v33, %v1292_v32  ;;  %v1708_v34 = vpop.f32.mrb[25].mxu1 }
 0x823   :  { %1718 = vmatmul.mubr.msk.f32.vlgmr.msra.gmra.mrb[26].mxu1 %vm137_vm0, %v1296_v2 }
 0x8f6   :  { %v1366_v11 = vpop.f32.mrb[26].mxu1 }
 0x8f7   :  { %v1440_v36 = vadd.f32 %v1439_v23, %v1366_v11  ;;  %v1719_v10 = vpop.f32.mrb[27].mxu1 }
 0x8f9   :  { %v1449_v37 = vadd.f32 %v1502_v35, %v1440_v36 }
 0x8fb   :  { %v1450_v38 = vmax.f32 %v1449_v37, 0.0 }
 0x8fd   :  { %1451 = vst.msk [vmem:[%s2380_s20] sm:$0xff] %vm137_vm0, %v1450_v38 }
 0x8fe   :  { %1460 = vsyncpa [#allocation3], 1 }
 0x8ff   :  { %1461 = vsyncpa [#allocation5], 1 }
 0x900   :  { %1462 = vsyncpa [#allocation8], 1 }

// kernel: decoder_forward.3
= control target key start
LH: loop header
LB: loop body
LE: loop exit
PB: predicated region body
PF: predicated region fallthrough
CT: control target
= control target key end

     0   :  { %s3167_s0 = inlined_call_operand.vmem [shape: f32[32,16], index: 0, kind: input, shape index: {}]   ;;  %s3168_s1 = inlined_call_operand.vmem [shape: f32[8,32], index: 1, kind: input, shape index: {}]   ;;  %s3169_s2 = inlined_call_operand.vmem [shape: f32[16,4], index: 2, kind: input, shape index: {}]   ;;  %s3170_s3 = inlined_call_operand.vmem [shape: s32[64,1], index: 3, kind: input, shape index: {}]   ;;  %s3171_s4 = inlined_call_operand.vmem [shape: s32[1,64], index: 4, kind: input, shape index: {}]   ;;  %s3172_s5 = inlined_call_operand.vmem [shape: f32[64,1], index: 5, kind: input, shape index: {}]   ;;  %s3173_s6 = inlined_call_operand.vmem [shape: f32[16,32], index: 6, kind: input, shape index: {}]   ;;  %s3174_s7 = inlined_call_operand.vmem [shape: f32[32,32], index: 7, kind: input, shape index: {}]   ;;  %s3175_s8 = inlined_call_operand.vmem [shape: f32[1,32], index: 8, kind: input, shape index: {}]   ;;  %s3176_s9 = inlined_call_operand.vmem [shape: f32[1,32], index: 9, kind: input, shape index: {}]   ;;  %s3177_s10 = inlined_call_operand.vmem [shape: f32[16,32], index: 10, kind: input, shape index: {}]   ;;  %s3178_s11 = inlined_call_operand.vmem [shape: f32[32,32], index: 11, kind: input, shape index: {}]   ;;  %s3179_s12 = inlined_call_operand.vmem [shape: f32[32,32], index: 12, kind: input, shape index: {}]   ;;  %s3180_s13 = inlined_call_operand.vmem [shape: f32[1,32], index: 13, kind: input, shape index: {}]   ;;  %s3181_s14 = inlined_call_operand.vmem [shape: f32[32,32], index: 14, kind: input, shape index: {}]   ;;  %s3182_s15 = inlined_call_operand.vmem [shape: f32[1,32], index: 15, kind: input, shape index: {}]   ;;  %s3183_s16 = inlined_call_operand.vmem [shape: f32[1,32], index: 16, kind: input, shape index: {}]   ;;  %s3184_s17 = inlined_call_operand.vmem [shape: f32[32,32], index: 17, kind: input, shape index: {}]   ;;  %s3185_s18 = inlined_call_operand.vmem [shape: f32[32,32], index: 18, kind: input, shape index: {}]   ;;  %s3186_s19 = inlined_call_operand.vmem [shape: f32[1,32], index: 19, kind: input, shape index: {}]   ;;  %s3187_s20 = inlined_call_operand.hbm [shape: f32[32,32], index: 20, kind: output, shape index: {}]  }
   0x1   :  { %3191 = sst [smem:[#allocation5_spill]] %s3167_s0 }
   0x2   :  { %3192 = sst [smem:[#allocation6_spill]] %s3168_s1 }
   0x3   :  { %3193 = sst [smem:[#allocation7_spill]] %s3169_s2 }
   0x4   :  { %3194 = sst [smem:[#allocation8_spill]] %s3170_s3 }
   0x5   :  { %3195 = sst [smem:[#allocation9_spill]] %s3171_s4 }
   0x6   :  { %s3196_s23 = sld [smem:[#allocation6_spill]]  ;;  %vm76_vm0 = vcmask 1043456   ;;  %s3197_s25 = sld [smem:[#allocation7_spill]]  ;;  %vm69_vm1 = vcmask 31744   ;;  %v2605_v5 = vmov 0  }
   0x7   :  { %s3198_s4 = sld [smem:[#allocation8_spill]]  ;;  %2571 = vset.pattern.permute.xlu0 %v2605_v5  ;;  %2572 = vset.pattern.permute.xlu1 %v2605_v5 }
   0xc   :  { %v68_v0 = vld [vmem:[%s3196_s23] sm:$0xff]  ;;  %v67_v2 = vld [vmem:[%s3197_s25 + $0x8] sm:$0xff] }
   0xd   :  { %v66_v1 = vld [vmem:[%s3197_s25] sm:$0xff]  ;;  %2194 = vmatprep.subr.msk.mxu0 %vm76_vm0, %v68_v0  ;;  %v155_v3 = vrot.slane %v68_v0, 4  ;;  %v239_v6 = vld [vmem:[%s3198_s4 + $0x10] sm:$0xff]  ;;  %v238_v7 = vld [vmem:[%s3198_s4 + $0x8] sm:$0xff] }
   0xe   :  { %2196 = vmatprep.mubr.msk.f32.mxu0 %vm69_vm1, %v66_v1  ;;  %2195 = vmatpush3.msk.msra.mxu0 %vm76_vm0, %v68_v0  ;;  %v237_v4 = vld [vmem:[%s3198_s4] sm:$0xff] }
   0xf   :  { %2201 = vmatprep.mubr.msk.f32.mxu1 %vm69_vm1, %v66_v1  ;;  %2197 = vmatmul.mubr.msk.f32.vlgmr.msra.gmra.mrb[0].mxu0 %vm69_vm1, %v67_v2 }
  0x10   :  { %2199 = vmatprep.subr.msk.mxu1 %vm76_vm0, %v155_v3  ;;  %248 = vperm.xlu0 %2571, %v237_v4  }
  0x11   :  { %2200 = vmatpush3.msk.msra.mxu1 %vm76_vm0, %v155_v3 }
  0x12   :  { %2202 = vmatmul.mubr.msk.f32.vlgmr.msra.gmra.mrb[0].mxu1 %vm69_vm1, %v67_v2 }
  0x13   :  { %25 = vsyncpa [#allocation3], 0  ;;  %254 = vperm.xlu1 %2572, %v239_v6   ;;  %v240_v8 = vld [vmem:[%s3198_s4 + $0x18] sm:$0xff]  ;;  %v241_v9 = vld [vmem:[%s3198_s4 + $0x20] sm:$0xff]  ;;  %s3199_s1 = sld [smem:[#allocation5_spill]]  ;;  %v245_v27 = vlaneseq  ;;  %vm361_vm2 = vcmask 261120  }
  0x14   :  { %251 = vperm.xlu0 %2571, %v238_v7   ;;  %v242_v10 = vld [vmem:[%s3198_s4 + $0x28] sm:$0xff]  ;;  %v243_v11 = vld [vmem:[%s3198_s4 + $0x30] sm:$0xff]  ;;  %v244_v12 = vld [vmem:[%s3198_s4 + $0x38] sm:$0xff]  ;;  %v2606_v30 = vmov 0.0   ;;  %vm725_vm11 = vcmask 130048   ;;  %s3200_s23 = sld [smem:[#allocation9_spill]] }
  0x15   :  { %v334_v13 = vld [vmem:[%s3172_s5] sm:$0xff]  ;;  %v335_v17 = vld [vmem:[%s3172_s5 + $0x8] sm:$0xff]  ;;  %v336_v20 = vld [vmem:[%s3172_s5 + $0x10] sm:$0xff]  ;;  %v246_v28 = vand.u32 127, %v245_v27  ;;  %vm317_vm13 = vcmask 523264  }
  0x16   :  { %v337_v22 = vld [vmem:[%s3172_s5 + $0x18] sm:$0xff]  ;;  %v338_v23 = vld [vmem:[%s3172_s5 + $0x20] sm:$0xff]  ;;  %v339_v24 = vld [vmem:[%s3172_s5 + $0x28] sm:$0xff] }
  0x17   :  { %257 = vperm.xlu1 %2572, %v240_v8   ;;  %v340_v25 = vld [vmem:[%s3172_s5 + $0x30] sm:$0xff]  ;;  %v341_v26 = vld [vmem:[%s3172_s5 + $0x38] sm:$0xff]  ;;  %v344_v52 = vld [vmem:[%s3174_s7] sm:$0xff] }
  0x18   :  { %260 = vperm.xlu0 %2571, %v241_v9   ;;  %v345_v53 = vld [vmem:[%s3174_s7 + $0x8] sm:$0xff]  ;;  %v346_v55 = vld [vmem:[%s3174_s7 + $0x10] sm:$0xff]  ;;  %v347_v56 = vld [vmem:[%s3174_s7 + $0x18] sm:$0xff] }
  0x19   :  { %v2754_v14 = vld [vmem:[%s3199_s1] sm:$0xff]  ;;  %v2759_v15 = vld [vmem:[%s3199_s1 + $0x8] sm:$0xff]  ;;  %v2769_v18 = vld [vmem:[%s3199_s1 + $0x10] sm:$0xff]  ;;  %v2446_v54 = vpack.c.bf16 %v345_v53, %v344_v52  ;;  %v2450_v57 = vpack.c.bf16 %v347_v56, %v346_v55 }
  0x1a   :  { %v2430_v16 = vpack.c.bf16 %v2759_v15, %v2754_v14  ;;  %v2774_v19 = vld [vmem:[%s3199_s1 + $0x18] sm:$0xff]  ;;  %v342_v58 = vld [vmem:[%s3173_s6] sm:$0xff]  ;;  %v343_v59 = vld [vmem:[%s3173_s6 + $0x8] sm:$0xff] }
  0x1b   :  { %263 = vperm.xlu1 %2572, %v242_v10   ;;  %v2434_v21 = vpack.c.bf16 %v2774_v19, %v2769_v18  ;;  %v2454_v60 = vpack.c.bf16 %v343_v59, %v342_v58 }
  0x1c   :  { %266 = vperm.xlu0 %2571, %v243_v11   ;;  %2431 = vmatprep.subr.bf16.mxu0 %v2430_v16 }
  0x1d   :  { %2433 = vmatpush3.bf16.msra.mxu0 %v2430_v16  ;;  %v1969_v16 = vld [vmem:[%s3200_s23] ss:$0 sm:$0xff] }
  0x1e   :  { %2435 = vmatprep.subr.bf16.mxu0 %v2434_v21 }
  0x1f   :  { %269 = vperm.xlu1 %2572, %v244_v12  }
  0x20   :  { %857 = vperm.xlu0 %2571, %v334_v13   ;;  %v297_v13 = vshrl.u32 %v245_v27, 7 }
  0x21   :  { %2437 = vmatpush3.bf16.msra.mxu0 %v2434_v21 }
  0x22   :  { %2447 = vmatprep.subr.bf16.mxu0 %v2446_v54  ;;  %vm305_vm12 = vcmp.eq.s32.totalorder %v1969_v16, %v297_v13  ;;  %v299_v21 = vadd.s32 16, %v297_v13 }
  0x23   :  { %862 = vperm.xlu1 %2572, %v335_v17   ;;  %v2906_v17 = vsel %vm305_vm12, 1.0, %v2606_v30 }
  0x24   :  { %867 = vperm.xlu0 %2571, %v336_v20   ;;  %v298_v20 = vadd.s32 8, %v297_v13  ;;  %vm307_vm15 = vcmp.eq.s32.totalorder %v1969_v16, %v299_v21 }
  0x26   :  { %vm306_vm14 = vcmp.eq.s32.totalorder %v1969_v16, %v298_v20 }
  0x27   :  { %872 = vperm.xlu1 %2572, %v337_v22   ;;  %v300_v22 = vadd.s32 24, %v297_v13 }
  0x28   :  { %877 = vperm.xlu0 %2571, %v338_v23   ;;  %v2911_v23 = vsel %vm306_vm14, 1.0, %v2606_v30 }
  0x29   :  { %vm308_vm0 = vcmp.eq.s32.totalorder %v1969_v16, %v300_v22 }
  0x2b   :  { %882 = vperm.xlu1 %2572, %v339_v24   ;;  %v318_v24 = vsel %vm317_vm13, %v2906_v17, 0.0 }
  0x2c   :  { %887 = vperm.xlu0 %2571, %v340_v25   ;;  %v321_v25 = vsel %vm317_vm13, %v2911_v23, 0.0 }
  0x2f   :  { %892 = vperm.xlu1 %2572, %v341_v26   ;;  %v2918_v26 = vsel %vm307_vm15, 1.0, %v2606_v30 }
  0x30   :  { %v324_v27 = vsel %vm317_vm13, %v2918_v26, 0.0 }
  0x4b   :  { %319 = vadd.xlane.f32.xlu0 %v318_v24 }
  0x4f   :  { %325 = vadd.xlane.f32.xlu0 %v324_v27 }
  0x53   :  { %322 = vadd.xlane.f32.xlu1 %v321_v25 }
  0x8f   :  { %v249_v29 = vpop.permute.xlu0 %248 }
  0x90   :  { %vm271_vm3 = vcmp.eq.s32.totalorder %v249_v29, %v246_v28 }
  0x91   :  { %v2798_v31 = vsel %vm271_vm3, 1.0, %v2606_v30 }
  0x92   :  { %v255_v32 = vpop.permute.xlu1 %254  ;;  %2212 = vmatprep.mubr.msk.f32.mxu0 %vm361_vm2, %v2798_v31  ;;  %2232 = vmatprep.mubr.msk.f32.mxu1 %vm361_vm2, %v2798_v31 }
  0x93   :  { %vm273_vm4 = vcmp.eq.s32.totalorder %v255_v32, %v246_v28  ;;  %v252_v33 = vpop.permute.xlu0 %251 }
  0x94   :  { %v2805_v34 = vsel %vm273_vm4, 1.0, %v2606_v30  ;;  %vm272_vm5 = vcmp.eq.s32.totalorder %v252_v33, %v246_v28 }
  0x95   :  { %v2808_v35 = vsel %vm272_vm5, 1.0, %v2606_v30 }
  0x96   :  { %v258_v36 = vpop.permute.xlu1 %257  ;;  %2213 = vmatmul.mubr.msk.f32.vlgmr.msra.gmra.mrb[2].mxu0 %vm361_vm2, %v2808_v35 }
  0x97   :  { %vm274_vm6 = vcmp.eq.s32.totalorder %v258_v36, %v246_v28  ;;  %v261_v38 = vpop.permute.xlu0 %260  ;;  %2215 = vmatprep.mubr.msk.f32.mxu0 %vm361_vm2, %v2805_v34  ;;  %2449 = vmatpush3.bf16.msra.mxu0 %v2446_v54  ;;  %v2006_v36 = vld [vmem:[%s3175_s8] ss:$0 sm:$0xff]  ;;  %s2607_s8 = smov [#allocation2]  }
  0x98   :  { %v2813_v37 = vsel %vm274_vm6, 1.0, %v2606_v30  ;;  %vm275_vm7 = vcmp.eq.s32.totalorder %v261_v38, %v246_v28  ;;  %2451 = vmatprep.subr.bf16.mxu0 %v2450_v57 }
  0x99   :  { %v2818_v39 = vsel %vm275_vm7, 1.0, %v2606_v30 }
  0x9a   :  { %v264_v40 = vpop.permute.xlu1 %263  ;;  %2216 = vmatmul.mubr.msk.f32.gmra.mrb[4].mxu0 %vm361_vm2, %v2813_v37 }
  0x9b   :  { %vm276_vm8 = vcmp.eq.s32.totalorder %v264_v40, %v246_v28  ;;  %v267_v42 = vpop.permute.xlu0 %266  ;;  %2218 = vmatprep.mubr.msk.f32.mxu0 %vm361_vm2, %v2818_v39  ;;  %2453 = vmatpush3.bf16.msra.mxu0 %v2450_v57 }
  0x9c   :  { %v2823_v41 = vsel %vm276_vm8, 1.0, %v2606_v30  ;;  %vm277_vm9 = vcmp.eq.s32.totalorder %v267_v42, %v246_v28  ;;  %2455 = vmatprep.subr.bf16.mxu0 %v2454_v60  ;;  %v2007_v42 = vld [vmem:[%s3176_s9] ss:$0 sm:$0xff]  ;;  %s1944_s9 = sshll.u32 %s2607_s8, 4  ;;  %s1945_s9 = int_to_ptr.vmem [resolvable:$true] %s1944_s9 }
  0x9d   :  { %v2828_v43 = vsel %vm277_vm9, 1.0, %v2606_v30  ;;  %p2586_p1 = scmp.lt.s32.totalorder %s1945_s9, %s1945_s9 }
  0x9e   :  { %v270_v44 = vpop.permute.xlu1 %269  ;;  %2219 = vmatmul.mubr.msk.f32.gmra.mrb[6].mxu0 %vm361_vm2, %v2823_v41 }
  0x9f   :  { %vm278_vm10 = vcmp.eq.s32.totalorder %v270_v44, %v246_v28  ;;  %2221 = vmatprep.mubr.msk.f32.mxu0 %vm361_vm2, %v2828_v43  ;;  %v2923_v28 = vsel %vm308_vm0, 1.0, %v2606_v30  ;;  %v2929_v32 = vpop.permute.xlu0 %857 }
  0xa0   :  { %v2833_v45 = vsel %vm278_vm10, 1.0, %v2606_v30  ;;  %v327_v29 = vsel %vm317_vm13, %v2923_v28, 0.0  ;;  %v901_v40 = vmul.f32 %v2006_v36, %v2929_v32 }
  0xa1   :  { %328 = vadd.xlane.f32.xlu0 %v327_v29 }
  0xa2   :  { %2222 = vmatmul.mubr.msk.f32.gmra.mrb[8].mxu0 %vm361_vm2, %v2833_v45 }
  0xa3   :  { %v2936_v38 = vpop.permute.xlu0 %867 }
  0xa4   :  { %v903_v57 = vmul.f32 %v2006_v36, %v2936_v38 }
  0xa7   :  { %v2946_v55 = vpop.permute.xlu0 %877 }
  0xe2   :  { %v2839_v46 = vpop.f32.mrb[0].mxu0 }
  0xe3   :  { %v2841_v47 = vpop.f32.mrb[1].mxu0 }
  0xe4   :  { %v2438_v48 = vpack.c.bf16 %v2839_v46, %v2841_v47 }
  0xe5   :  { %v2845_v49 = vpop.f32.mrb[0].mxu1 }
  0xe6   :  { %v2847_v50 = vpop.f32.mrb[1].mxu1  ;;  %2439 = vmatprep.subr.bf16.mxu1 %v2438_v48 }
  0xe7   :  { %v2442_v51 = vpack.c.bf16 %v2845_v49, %v2847_v50  ;;  %2441 = vmatpush3.bf16.msra.mxu1 %v2438_v48 }
  0xe9   :  { %2443 = vmatprep.subr.bf16.mxu1 %v2442_v51 }
  0xeb   :  { %2445 = vmatpush3.bf16.msra.mxu1 %v2442_v51 }
  0xee   :  { %2233 = vmatmul.mubr.msk.f32.vlgmr.msra.gmra.mrb[2].mxu1 %vm361_vm2, %v2808_v35 }
  0xef   :  { %2235 = vmatprep.mubr.msk.f32.mxu1 %vm361_vm2, %v2805_v34 }
  0xf2   :  { %2236 = vmatmul.mubr.msk.f32.gmra.mrb[4].mxu1 %vm361_vm2, %v2813_v37 }
  0xf3   :  { %2238 = vmatprep.mubr.msk.f32.mxu1 %vm361_vm2, %v2818_v39 }
  0xf6   :  { %2239 = vmatmul.mubr.msk.f32.gmra.mrb[6].mxu1 %vm361_vm2, %v2823_v41 }
  0xf7   :  { %2241 = vmatprep.mubr.msk.f32.mxu1 %vm361_vm2, %v2828_v43 }
  0xfa   :  { %2242 = vmatmul.mubr.msk.f32.gmra.mrb[8].mxu1 %vm361_vm2, %v2833_v45 }
  0xfb   :  { %2296 = vmatprep.mubr.msk.f32.mxu1 %vm317_vm13, %v2906_v17 }
 0x169   :  { %v2214_v61 = vpop.f32.mrb[2].mxu0 }
 0x16a   :  { %v452_v62 = vpop.f32.mrb[3].mxu0 }
 0x16d   :  { %v2217_v63 = vpop.f32.mrb[4].mxu0 }
 0x16e   :  { %v462_v0 = vpop.f32.mrb[5].mxu0 }
 0x171   :  { %v2220_v1 = vpop.f32.mrb[6].mxu0 }
 0x172   :  { %v472_v2 = vpop.f32.mrb[7].mxu0 }
 0x175   :  { %v2223_v3 = vpop.f32.mrb[8].mxu0 }
 0x176   :  { %v482_v4 = vpop.f32.mrb[9].mxu0 }
 0x1c1   :  { %v2234_v5 = vpop.f32.mrb[2].mxu1 }
 0x1c2   :  { %v557_v6 = vpop.f32.mrb[3].mxu1 }
 0x1c3   :  { %2252 = vmatprep.mubr.msk.f32.mxu0 %vm361_vm2, %v557_v6 }
 0x1c4   :  { %2253 = vmatmul.mubr.msk.f32.vlgmr.msra.gmra.mrb[10].mxu0 %vm361_vm2, %v2234_v5 }
 0x1c5   :  { %v2237_v7 = vpop.f32.mrb[4].mxu1  ;;  %2457 = vmatpush3.bf16.msra.mxu0 %v2454_v60 }
 0x1c6   :  { %v567_v8 = vpop.f32.mrb[5].mxu1 }
 0x1c7   :  { %2255 = vmatprep.mubr.msk.f32.mxu0 %vm361_vm2, %v567_v8  ;;  %v2953_v8 = vpop.permute.xlu0 %887 }
 0x1c8   :  { %2256 = vmatmul.mubr.msk.f32.gmra.mrb[12].mxu0 %vm361_vm2, %v2237_v7  ;;  %v907_v21 = vmul.f32 %v2006_v36, %v2953_v8 }
 0x1c9   :  { %v2240_v9 = vpop.f32.mrb[6].mxu1 }
 0x1ca   :  { %v577_v10 = vpop.f32.mrb[7].mxu1 }
 0x1cb   :  { %2258 = vmatprep.mubr.msk.f32.mxu0 %vm361_vm2, %v577_v10 }
 0x1cc   :  { %2259 = vmatmul.mubr.msk.f32.gmra.mrb[14].mxu0 %vm361_vm2, %v2240_v9 }
 0x1cd   :  { %v2243_v11 = vpop.f32.mrb[8].mxu1 }
 0x1ce   :  { %v587_v12 = vpop.f32.mrb[9].mxu1 }
 0x1cf   :  { %2261 = vmatprep.mubr.msk.f32.mxu0 %vm361_vm2, %v587_v12 }
 0x1d0   :  { %2262 = vmatmul.mubr.msk.f32.gmra.mrb[16].mxu0 %vm361_vm2, %v2243_v11 }
 0x1d1   :  { %2268 = vmatprep.mubr.msk.f32.mxu0 %vm725_vm11, %v452_v62 }
 0x1d4   :  { %2269 = vmatmul.mubr.msk.f32.vlgmr.msra.gmra.mrb[10].mxu0 %vm725_vm11, %v2214_v61 }
 0x1d5   :  { %2271 = vmatprep.mubr.msk.f32.mxu0 %vm725_vm11, %v462_v0 }
 0x1d8   :  { %2272 = vmatmul.mubr.msk.f32.gmra.mrb[12].mxu0 %vm725_vm11, %v2217_v63 }
 0x1d9   :  { %2274 = vmatprep.mubr.msk.f32.mxu0 %vm725_vm11, %v472_v2 }
 0x1dc   :  { %2275 = vmatmul.mubr.msk.f32.gmra.mrb[14].mxu0 %vm725_vm11, %v2220_v1 }
 0x1dd   :  { %2277 = vmatprep.mubr.msk.f32.mxu0 %vm725_vm11, %v482_v4 }
 0x1e0   :  { %2278 = vmatmul.mubr.msk.f32.gmra.mrb[16].mxu0 %vm725_vm11, %v2223_v3  ;;  %v905_v3 = vmul.f32 %v2006_v36, %v2946_v55 }
 0x1e1   :  { %2348 = vmatprep.mubr.msk.f32.mxu0 %vm361_vm2, %v2798_v31  ;;  %v2927_v31 = vpop.permute.xlu1 %862 }
 0x1e2   :  { %v902_v30 = vmul.f32 %v2006_v36, %v2927_v31 }
 0x1e5   :  { %v2931_v33 = vpop.permute.xlu1 %872 }
 0x1e6   :  { %v904_v54 = vmul.f32 %v2006_v36, %v2931_v33 }
 0x1e9   :  { %v2943_v52 = vpop.permute.xlu1 %882 }
 0x1ea   :  { %v906_v1 = vmul.f32 %v2006_v36, %v2943_v52 }
 0x1ed   :  { %v2951_v4 = vpop.permute.xlu1 %892 }
 0x1ee   :  { %v908_v16 = vmul.f32 %v2006_v36, %v2951_v4  ;;  %v353_v36 = vld [vmem:[%s3178_s11 + $0x8] sm:$0xff] }
 0x2a7   :  { %v2270_v44 = vpop.f32.mrb[10].mxu0 }
 0x2a8   :  { %v910_v48 = vadd.f32 %v2270_v44, %v902_v30  ;;  %v816_v51 = vpop.f32.mrb[11].mxu0 }
 0x2a9   :  { %v909_v53 = vadd.f32 %v901_v40, %v816_v51 }
 0x2aa   :  { %v924_v56 = vadd.f32 %v2007_v42, %v910_v48 }
 0x2ab   :  { %v923_v58 = vadd.f32 %v2007_v42, %v909_v53  ;;  %v2273_v59 = vpop.f32.mrb[12].mxu0 }
 0x2ac   :  { %v932_v60 = vmax.f32 %v924_v56, 0.0  ;;  %v912_v61 = vadd.f32 %v2273_v59, %v904_v54  ;;  %v826_v62 = vpop.f32.mrb[13].mxu0  ;;  %v352_v56 = vld [vmem:[%s3178_s11] sm:$0xff] }
 0x2ad   :  { %v931_v63 = vmax.f32 %v923_v58, 0.0  ;;  %v911_v0 = vadd.f32 %v903_v57, %v826_v62  ;;  %v2474_v59 = vpack.c.bf16 %v353_v36, %v352_v56  ;;  %v350_v62 = vld [vmem:[%s3177_s10] sm:$0xff] }
 0x2ae   :  { %v926_v2 = vadd.f32 %v2007_v42, %v912_v61 }
 0x2af   :  { %v925_v5 = vadd.f32 %v2007_v42, %v911_v0  ;;  %v2276_v6 = vpop.f32.mrb[14].mxu0  ;;  %v2458_v7 = vpack.c.bf16 %v932_v60, %v931_v63  ;;  %v354_v60 = vld [vmem:[%s3178_s11 + $0x10] sm:$0xff]  ;;  %v351_v63 = vld [vmem:[%s3177_s10 + $0x8] sm:$0xff] }
 0x2b0   :  { %v934_v9 = vmax.f32 %v926_v2, 0.0  ;;  %v914_v10 = vadd.f32 %v2276_v6, %v906_v1  ;;  %v836_v11 = vpop.f32.mrb[15].mxu0  ;;  %v2482_v0 = vpack.c.bf16 %v351_v63, %v350_v62  ;;  %v356_v1 = vld [vmem:[%s3179_s12] sm:$0xff]  ;;  %v357_v2 = vld [vmem:[%s3179_s12 + $0x8] sm:$0xff] }
 0x2b1   :  { %v933_v12 = vmax.f32 %v925_v5, 0.0  ;;  %v913_v13 = vadd.f32 %v905_v3, %v836_v11  ;;  %2459 = vmatprep.subr.bf16.mxu1 %v2458_v7  ;;  %v2486_v3 = vpack.c.bf16 %v357_v2, %v356_v1 }
 0x2b2   :  { %v928_v20 = vadd.f32 %v2007_v42, %v914_v10  ;;  %2461 = vmatpush3.bf16.msra.mxu1 %v2458_v7 }
 0x2b3   :  { %v927_v22 = vadd.f32 %v2007_v42, %v913_v13  ;;  %v2279_v24 = vpop.f32.mrb[16].mxu0  ;;  %v2462_v25 = vpack.c.bf16 %v934_v9, %v933_v12 }
 0x2b4   :  { %v936_v27 = vmax.f32 %v928_v20, 0.0  ;;  %v916_v29 = vadd.f32 %v2279_v24, %v908_v16  ;;  %v846_v30 = vpop.f32.mrb[17].mxu0 }
 0x2b5   :  { %v935_v40 = vmax.f32 %v927_v22, 0.0  ;;  %v915_v44 = vadd.f32 %v907_v21, %v846_v30  ;;  %2463 = vmatprep.subr.bf16.mxu1 %v2462_v25  ;;  %v1354_v30 = vld [vmem:[%s3181_s14 + $0x8] sm:$0xff] }
 0x2b6   :  { %v930_v48 = vadd.f32 %v2007_v42, %v916_v29  ;;  %2465 = vmatpush3.bf16.msra.mxu1 %v2462_v25  ;;  %v1353_v29 = vld [vmem:[%s3181_s14] sm:$0xff] }
 0x2b7   :  { %v929_v51 = vadd.f32 %v2007_v42, %v915_v44  ;;  %v2466_v53 = vpack.c.bf16 %v936_v27, %v935_v40  ;;  %v355_v42 = vld [vmem:[%s3178_s11 + $0x18] sm:$0xff]  ;;  %v1355_v40 = vld [vmem:[%s3181_s14 + $0x10] sm:$0xff]  ;;  %v2502_v44 = vpack.c.bf16 %v1354_v30, %v1353_v29 }
 0x2b8   :  { %v938_v54 = vmax.f32 %v930_v48, 0.0  ;;  %v2478_v61 = vpack.c.bf16 %v355_v42, %v354_v60  ;;  %v1356_v48 = vld [vmem:[%s3181_s14 + $0x18] sm:$0xff] }
 0x2b9   :  { %v937_v57 = vmax.f32 %v929_v51, 0.0  ;;  %2467 = vmatprep.subr.bf16.mxu1 %v2466_v53  ;;  %v2506_v51 = vpack.c.bf16 %v1356_v48, %v1355_v40 }
 0x2ba   :  { %2469 = vmatpush3.bf16.msra.mxu1 %v2466_v53  ;;  %v2024_v53 = vld [vmem:[%s3180_s13] ss:$0 sm:$0xff] }
 0x2bb   :  { %v2470_v58 = vpack.c.bf16 %v938_v54, %v937_v57 }
 0x2bd   :  { %2471 = vmatprep.subr.bf16.mxu1 %v2470_v58 }
 0x2be   :  { %2473 = vmatpush3.bf16.msra.mxu1 %v2470_v58 }
 0x2bf   :  { %2475 = vmatprep.subr.bf16.mxu1 %v2474_v59 }
 0x2c1   :  { %2297 = vmatmul.mubr.msk.f32.vlgmr.msra.gmra.mrb[10].mxu1 %vm317_vm13, %v2911_v23 }
 0x2c2   :  { %2477 = vmatpush3.bf16.msra.mxu1 %v2474_v59  ;;  %2299 = vmatprep.mubr.msk.f32.mxu1 %vm317_vm13, %v2918_v26 }
 0x2c3   :  { %2479 = vmatprep.subr.bf16.mxu1 %v2478_v61 }
 0x2c5   :  { %2300 = vmatmul.mubr.msk.f32.gmra.mrb[12].mxu1 %vm317_vm13, %v2923_v28 }
 0x2c6   :  { %2481 = vmatpush3.bf16.msra.mxu1 %v2478_v61  ;;  %2310 = vmatprep.mubr.msk.f32.mxu1 %vm361_vm2, %v2841_v47  ;;  %v359_v47 = vld [vmem:[%s3179_s12 + $0x18] sm:$0xff] }
 0x2c7   :  { %2483 = vmatprep.subr.bf16.mxu1 %v2482_v0 }
 0x2c9   :  { %2311 = vmatmul.mubr.msk.f32.vlgmr.msra.gmra.mrb[14].mxu1 %vm361_vm2, %v2839_v46  ;;  %v358_v46 = vld [vmem:[%s3179_s12 + $0x10] sm:$0xff] }
 0x2ca   :  { %2313 = vmatprep.mubr.msk.f32.mxu1 %vm361_vm2, %v2847_v50  ;;  %2485 = vmatpush3.bf16.msra.mxu1 %v2482_v0  ;;  %v323_v50 = vpop.xlane.xlu1 %322 }
 0x2cb   :  { %2487 = vmatprep.subr.bf16.mxu1 %v2486_v3  ;;  %v331_v5 = vmax.f32 %v323_v50, 1.0  ;;  %v2042_v50 = vld [vmem:[%s3183_s16] ss:$0 sm:$0xff] }
 0x2cd   :  { %2314 = vmatmul.mubr.msk.f32.gmra.mrb[16].mxu1 %vm361_vm2, %v2845_v49  ;;  %v2490_v49 = vpack.c.bf16 %v359_v47, %v358_v46  ;;  %2573 = vrcp.f32 %v331_v5  ;;  %v1364_v46 = vld [vmem:[%s3185_s18 + $0x8] sm:$0xff] }
 0x2ce   :  { %2320 = vmatprep.mubr.msk.f32.mxu1 %vm725_vm11, %v2754_v14  ;;  %v320_v14 = vpop.xlane.xlu0 %319 }
 0x2cf   :  { %v330_v6 = vmax.f32 %v320_v14, 1.0 }
 0x2d1   :  { %2321 = vmatmul.mubr.msk.f32.vlgmr.msra.gmra.mrb[14].mxu1 %vm725_vm11, %v2759_v15  ;;  %2575 = vrcp.f32 %v330_v6 }
 0x2d2   :  { %2489 = vmatpush3.bf16.msra.mxu1 %v2486_v3  ;;  %2323 = vmatprep.mubr.msk.f32.mxu1 %vm725_vm11, %v2769_v18  ;;  %v326_v15 = vpop.xlane.xlu0 %325  ;;  %v1363_v3 = vld [vmem:[%s3185_s18] sm:$0xff] }
 0x2d3   :  { %2491 = vmatprep.subr.bf16.mxu1 %v2490_v49  ;;  %v2526_v47 = vpack.c.bf16 %v1364_v46, %v1363_v3 }
 0x2d5   :  { %2324 = vmatmul.mubr.msk.f32.gmra.mrb[16].mxu1 %vm725_vm11, %v2774_v19  ;;  %v332_v19 = vmax.f32 %v326_v15, 1.0 }
 0x2d6   :  { %2493 = vmatpush3.bf16.msra.mxu1 %v2490_v49  ;;  %v329_v18 = vpop.xlane.xlu0 %328  ;;  %v2033_v49 = vld [vmem:[%s3182_s15] ss:$0 sm:$0xff] }
 0x2d7   :  { %v333_v7 = vmax.f32 %v329_v18, 1.0  ;;  %v3009_v9 = vpop.eup %2573  ;;  %2503 = vmatprep.subr.bf16.mxu1 %v2502_v44  ;;  %v1480_v14 = vmul.f32 %v2033_v49, %v2927_v31  ;;  %v1479_v15 = vmul.f32 %v2033_v49, %v2929_v32  ;;  %v1483_v30 = vmul.f32 %v2033_v49, %v2946_v55 }
 0x2d9   :  { %2577 = vrcp.f32 %v333_v7 }
 0x2da   :  { %2579 = vrcp.f32 %v332_v19  ;;  %v1482_v19 = vmul.f32 %v2033_v49, %v2931_v33 }
 0x2db   :  { %v3011_v11 = vpop.eup %2575 }
 0x2e3   :  { %v3015_v20 = vpop.eup %2577 }
 0x2e4   :  { %v3018_v22 = vpop.eup %2579 }
 0x394   :  { %v2298_v10 = vpop.f32.mrb[10].mxu1 }
 0x395   :  { %v1017_v12 = vpop.f32.mrb[11].mxu1  ;;  %v1039_v16 = vmul.f32 %v3009_v9, %v2298_v10 }
 0x396   :  { %v1037_v13 = vmul.f32 %v3011_v11, %v1017_v12  ;;  %v1481_v12 = vmul.f32 %v2033_v49, %v2936_v38 }
 0x398   :  { %v2301_v21 = vpop.f32.mrb[12].mxu1  ;;  %2334 = vmatprep.mubr.msk.f32.mxu1 %vm361_vm2, %v1037_v13 }
 0x399   :  { %v1027_v24 = vpop.f32.mrb[13].mxu1  ;;  %2335 = vmatmul.mubr.msk.f32.vlgmr.msra.gmra.mrb[14].mxu1 %vm361_vm2, %v1039_v16  ;;  %v1043_v27 = vmul.f32 %v3015_v20, %v2301_v21 }
 0x39a   :  { %v1041_v25 = vmul.f32 %v3018_v22, %v1027_v24  ;;  %2505 = vmatpush3.bf16.msra.mxu1 %v2502_v44 }
 0x39b   :  { %2507 = vmatprep.subr.bf16.mxu1 %v2506_v51 }
 0x39c   :  { %2337 = vmatprep.mubr.msk.f32.mxu1 %vm361_vm2, %v1041_v25 }
 0x39d   :  { %2338 = vmatmul.mubr.msk.f32.gmra.mrb[16].mxu1 %vm361_vm2, %v1043_v27  ;;  %v1484_v27 = vmul.f32 %v2033_v49, %v2943_v52 }
 0x39e   :  { %2509 = vmatpush3.bf16.msra.mxu1 %v2506_v51 }
 0x39f   :  { %2527 = vmatprep.subr.bf16.mxu1 %v2526_v47 }
 0x46c   :  { %v2336_v54 = vpop.f32.mrb[14].mxu1 }
 0x46d   :  { %v3040_v56 = vadd.f32 %v2336_v54, %v2024_v53  ;;  %v1316_v36 = vpop.f32.mrb[15].mxu1 }
 0x46e   :  { %v3042_v57 = vadd.f32 %v2024_v53, %v1316_v36  ;;  %v1486_v36 = vmul.f32 %v2033_v49, %v2951_v4  ;;  %v1359_v4 = vld [vmem:[%s3184_s17] sm:$0xff] }
 0x46f   :  { %v1350_v58 = vmax.f32 %v3040_v56, 0.0 }
 0x470   :  { %v1349_v59 = vmax.f32 %v3042_v57, 0.0  ;;  %v2339_v60 = vpop.f32.mrb[16].mxu1 }
 0x471   :  { %v3046_v42 = vadd.f32 %v2339_v60, %v2024_v53  ;;  %v1326_v61 = vpop.f32.mrb[17].mxu1 }
 0x472   :  { %v2494_v62 = vpack.c.bf16 %v1350_v58, %v1349_v59  ;;  %v3052_v63 = vadd.f32 %v2024_v53, %v1326_v61  ;;  %v1485_v61 = vmul.f32 %v2033_v49, %v2953_v8  ;;  %v1360_v8 = vld [vmem:[%s3184_s17 + $0x8] sm:$0xff]  ;;  %v1361_v49 = vld [vmem:[%s3184_s17 + $0x10] sm:$0xff] }
 0x473   :  { %v1352_v0 = vmax.f32 %v3046_v42, 0.0 }
 0x474   :  { %v1351_v1 = vmax.f32 %v3052_v63, 0.0  ;;  %2495 = vmatprep.subr.bf16.mxu0 %v2494_v62 }
 0x475   :  { %2497 = vmatpush3.bf16.msra.mxu0 %v2494_v62 }
 0x476   :  { %v2498_v2 = vpack.c.bf16 %v1352_v0, %v1351_v1 }
 0x478   :  { %2499 = vmatprep.subr.bf16.mxu0 %v2498_v2 }
 0x479   :  { %2501 = vmatpush3.bf16.msra.mxu0 %v2498_v2 }
 0x47c   :  { %2349 = vmatmul.mubr.msk.f32.vlgmr.msra.gmra.mrb[18].mxu0 %vm361_vm2, %v2808_v35 }
 0x47d   :  { %2351 = vmatprep.mubr.msk.f32.mxu0 %vm361_vm2, %v2805_v34 }
 0x480   :  { %2352 = vmatmul.mubr.msk.f32.gmra.mrb[20].mxu0 %vm361_vm2, %v2813_v37 }
 0x481   :  { %2354 = vmatprep.mubr.msk.f32.mxu0 %vm361_vm2, %v2818_v39 }
 0x484   :  { %2355 = vmatmul.mubr.msk.f32.gmra.mrb[22].mxu0 %vm361_vm2, %v2823_v41 }
 0x485   :  { %2357 = vmatprep.mubr.msk.f32.mxu0 %vm361_vm2, %v2828_v43 }
 0x488   :  { %2358 = vmatmul.mubr.msk.f32.gmra.mrb[24].mxu0 %vm361_vm2, %v2833_v45 }
 0x489   :  { %2396 = vmatprep.mubr.msk.f32.mxu0 %vm317_vm13, %v2906_v17 }
 0x54f   :  { %v2350_v35 = vpop.f32.mrb[18].mxu0 }
 0x550   :  { %v1434_v34 = vpop.f32.mrb[19].mxu0 }
 0x551   :  { %2368 = vmatprep.mubr.msk.f32.mxu1 %vm361_vm2, %v1434_v34 }
 0x552   :  { %2369 = vmatmul.mubr.msk.f32.vlgmr.msra.gmra.mrb[18].mxu1 %vm361_vm2, %v2350_v35 }
 0x553   :  { %v2353_v37 = vpop.f32.mrb[20].mxu0  ;;  %2529 = vmatpush3.bf16.msra.mxu1 %v2526_v47  ;;  %v2534_v47 = vpack.c.bf16 %v1360_v8, %v1359_v4 }
 0x554   :  { %v1444_v39 = vpop.f32.mrb[21].mxu0 }
 0x555   :  { %2371 = vmatprep.mubr.msk.f32.mxu1 %vm361_vm2, %v1444_v39 }
 0x556   :  { %2372 = vmatmul.mubr.msk.f32.gmra.mrb[20].mxu1 %vm361_vm2, %v2353_v37 }
 0x557   :  { %v2356_v41 = vpop.f32.mrb[22].mxu0 }
 0x558   :  { %v1454_v43 = vpop.f32.mrb[23].mxu0 }
 0x559   :  { %2374 = vmatprep.mubr.msk.f32.mxu1 %vm361_vm2, %v1454_v43 }
 0x55a   :  { %2375 = vmatmul.mubr.msk.f32.gmra.mrb[22].mxu1 %vm361_vm2, %v2356_v41 }
 0x55b   :  { %v2359_v45 = vpop.f32.mrb[24].mxu0 }
 0x55c   :  { %v1464_v17 = vpop.f32.mrb[25].mxu0 }
 0x55d   :  { %2377 = vmatprep.mubr.msk.f32.mxu1 %vm361_vm2, %v1464_v17 }
 0x55e   :  { %2378 = vmatmul.mubr.msk.f32.gmra.mrb[24].mxu1 %vm361_vm2, %v2359_v45 }
 0x625   :  { %v2370_v5 = vpop.f32.mrb[18].mxu1 }
 0x626   :  { %v1583_v6 = vadd.f32 %v2370_v5, %v1480_v14  ;;  %v1577_v18 = vpop.f32.mrb[19].mxu1  ;;  %v1362_v14 = vld [vmem:[%s3184_s17 + $0x18] sm:$0xff] }
 0x627   :  { %v1578_v7 = vadd.f32 %v1577_v18, %v1479_v15  ;;  %v2538_v15 = vpack.c.bf16 %v1362_v14, %v1361_v49 }
 0x628   :  { %v1623_v10 = vadd.f32 %v2042_v50, %v1583_v6 }
 0x629   :  { %v1622_v13 = vadd.f32 %v2042_v50, %v1578_v7  ;;  %v2373_v16 = vpop.f32.mrb[20].mxu1 }
 0x62a   :  { %v1631_v21 = vmax.f32 %v1623_v10, 0.0  ;;  %v1593_v24 = vadd.f32 %v2373_v16, %v1482_v19  ;;  %v1587_v31 = vpop.f32.mrb[21].mxu1 }
 0x62b   :  { %v1630_v25 = vmax.f32 %v1622_v13, 0.0  ;;  %v1588_v32 = vadd.f32 %v1587_v31, %v1481_v12 }
 0x62c   :  { %v1625_v29 = vadd.f32 %v2042_v50, %v1593_v24 }
 0x62d   :  { %v1624_v40 = vadd.f32 %v2042_v50, %v1588_v32  ;;  %v2376_v44 = vpop.f32.mrb[22].mxu1  ;;  %v2510_v48 = vpack.c.bf16 %v1631_v21, %v1630_v25 }
 0x62e   :  { %v1633_v51 = vmax.f32 %v1625_v29, 0.0  ;;  %v1603_v33 = vadd.f32 %v2376_v44, %v1484_v27  ;;  %v1597_v53 = vpop.f32.mrb[23].mxu1 }
 0x62f   :  { %v1632_v54 = vmax.f32 %v1624_v40, 0.0  ;;  %v1598_v38 = vadd.f32 %v1597_v53, %v1483_v30  ;;  %2511 = vmatprep.subr.bf16.mxu0 %v2510_v48 }
 0x630   :  { %v1627_v60 = vadd.f32 %v2042_v50, %v1603_v33  ;;  %2513 = vmatpush3.bf16.msra.mxu0 %v2510_v48 }
 0x631   :  { %v1626_v62 = vadd.f32 %v2042_v50, %v1598_v38  ;;  %v2379_v52 = vpop.f32.mrb[24].mxu1  ;;  %v2514_v2 = vpack.c.bf16 %v1633_v51, %v1632_v54 }
 0x632   :  { %v1635_v35 = vmax.f32 %v1627_v60, 0.0  ;;  %v1613_v55 = vadd.f32 %v2379_v52, %v1486_v36  ;;  %v1607_v34 = vpop.f32.mrb[25].mxu1 }
 0x633   :  { %v1634_v37 = vmax.f32 %v1626_v62, 0.0  ;;  %v1608_v39 = vadd.f32 %v1607_v34, %v1485_v61  ;;  %2515 = vmatprep.subr.bf16.mxu0 %v2514_v2 }
 0x634   :  { %v1629_v41 = vadd.f32 %v2042_v50, %v1613_v55  ;;  %2517 = vmatpush3.bf16.msra.mxu0 %v2514_v2 }
 0x635   :  { %v1628_v43 = vadd.f32 %v2042_v50, %v1608_v39  ;;  %v2518_v45 = vpack.c.bf16 %v1635_v35, %v1634_v37 }
 0x636   :  { %v1637_v17 = vmax.f32 %v1629_v41, 0.0 }
 0x637   :  { %v1636_v3 = vmax.f32 %v1628_v43, 0.0  ;;  %2519 = vmatprep.subr.bf16.mxu0 %v2518_v45 }
 0x638   :  { %2521 = vmatpush3.bf16.msra.mxu0 %v2518_v45 }
 0x639   :  { %v2522_v46 = vpack.c.bf16 %v1637_v17, %v1636_v3 }
 0x63b   :  { %2523 = vmatprep.subr.bf16.mxu0 %v2522_v46 }
 0x63c   :  { %2525 = vmatpush3.bf16.msra.mxu0 %v2522_v46 }
 0x63d   :  { %2535 = vmatprep.subr.bf16.mxu0 %v2534_v47 }
 0x63f   :  { %2397 = vmatmul.mubr.msk.f32.vlgmr.msra.gmra.mrb[26].mxu0 %vm317_vm13, %v2911_v23  ;;  %v1365_v23 = vld [vmem:[%s3185_s18 + $0x10] sm:$0xff] }
 0x640   :  { %2537 = vmatpush3.bf16.msra.mxu0 %v2534_v47  ;;  %2399 = vmatprep.mubr.msk.f32.mxu0 %vm317_vm13, %v2918_v26  ;;  %v1366_v26 = vld [vmem:[%s3185_s18 + $0x18] sm:$0xff] }
 0x641   :  { %2539 = vmatprep.subr.bf16.mxu0 %v2538_v15  ;;  %v2530_v50 = vpack.c.bf16 %v1366_v26, %v1365_v23 }
 0x643   :  { %2400 = vmatmul.mubr.msk.f32.gmra.mrb[28].mxu0 %vm317_vm13, %v2923_v28  ;;  %2531 = vmatprep.subr.bf16.mxu1 %v2530_v50 }
 0x644   :  { %2541 = vmatpush3.bf16.msra.mxu0 %v2538_v15  ;;  %2424 = vmatprep.mubr.msk.f32.mxu0 %vm361_vm2, %v1349_v59 }
 0x645   :  { %2533 = vmatpush3.bf16.msra.mxu1 %v2530_v50 }
 0x646   :  { %2542 = vmatprep.subr.bf16.mxu1 %v2534_v47 }
 0x647   :  { %2425 = vmatmul.mubr.msk.f32.vlgmr.msra.gmra.mrb[30].mxu0 %vm361_vm2, %v1350_v58 }
 0x712   :  { %v2398_v28 = vpop.f32.mrb[26].mxu0 }
 0x713   :  { %v1704_v57 = vpop.f32.mrb[27].mxu0  ;;  %v1724_v56 = vmul.f32 %v3009_v9, %v2398_v28  ;;  %v2055_v9 = vld [vmem:[%s3186_s19] ss:$0 sm:$0xff]  ;;  %s2581_s19 = scalar_lea.vmem %s1945_s9, 512 }
 0x714   :  { %v1723_v59 = vmul.f32 %v3011_v11, %v1704_v57  ;;  %p2582_p0 = scmp.ne.s32.totalorder %s1945_s9, %s2581_s19  ;;  %p2587_p2 = scmp.lt.s32.totalorder %s2581_s19, %s2581_s19 }
 0x716   :  { %v2401_v5 = vpop.f32.mrb[28].mxu0  ;;  %2410 = vmatprep.mubr.msk.f32.mxu1 %vm361_vm2, %v1723_v59  ;;  %p2588_p3 = por %p2587_p2, %p2586_p1 }
 0x717   :  { %v1714_v58 = vpop.f32.mrb[29].mxu0  ;;  %2411 = vmatmul.mubr.msk.f32.vlgmr.msra.gmra.mrb[26].mxu1 %vm361_vm2, %v1724_v56  ;;  %v1726_v18 = vmul.f32 %v3015_v20, %v2401_v5 }
 0x718   :  { %v1725_v6 = vmul.f32 %v3018_v22, %v1714_v58  ;;  %2544 = vmatpush3.bf16.msra.mxu1 %v2534_v47  ;;  %p2589_p4 = pnand %p2588_p3, %p2582_p0 }
 0x719   :  { %2543 = vmatprep.subr.bf16.mxu1 %v2538_v15 }
 0x71a   :  { %2413 = vmatprep.mubr.msk.f32.mxu1 %vm361_vm2, %v1725_v6  ;;  %v2426_v7 = vpop.f32.mrb[30].mxu0 }
 0x71b   :  { %2414 = vmatmul.mubr.msk.f32.gmra.mrb[28].mxu1 %vm361_vm2, %v1726_v18  ;;  %v1902_v11 = vpop.f32.mrb[31].mxu0 }
 0x71c   :  { %2427 = vmatprep.mubr.msk.f32.mxu1 %vm361_vm2, %v1351_v1  ;;  %2545 = vmatpush3.bf16.msra.mxu1 %v2538_v15 }
 0x723   :  { %2428 = vmatmul.mubr.msk.f32.vlgmr.msra.gmra.mrb[28].mxu1 %vm361_vm2, %v1352_v0 }
 0x7ea   :  { %v2412_v20 = vpop.f32.mrb[26].mxu1 }
 0x7eb   :  { %v1908_v22 = vadd.f32 %v2426_v7, %v2412_v20  ;;  %v1805_v19 = vpop.f32.mrb[27].mxu1 }
 0x7ec   :  { %v1903_v10 = vadd.f32 %v1902_v11, %v1805_v19 }
 0x7ed   :  { %v1928_v12 = vadd.f32 %v2055_v9, %v1908_v22 }
 0x7ee   :  { %v1927_v13 = vadd.f32 %v2055_v9, %v1903_v10 }
 0x7ef   :  { %v1932_v16 = vmax.f32 %v1928_v12, 0.0 }
 0x7f0   :  { %v1931_v21 = vmax.f32 %v1927_v13, 0.0 }
 0x7f1   :  { %1936 = vst.msk [vmem:[#allocation2 + $0x8] sm:$0xff] %vm361_vm2, %v1932_v16 }
 0x7f2   :  { %1935 = vst.msk [vmem:[#allocation2] sm:$0xff] %vm361_vm2, %v1931_v21 }
 0x7f6   :  { %v2429_v63 = vpop.f32.mrb[28].mxu1 }
 0x7f7   :  { %v1930_v42 = vadd.f32 %v2429_v63, %v2055_v9  ;;  %v1912_v0 = vpop.f32.mrb[29].mxu1 }
 0x7f8   :  { %v1929_v1 = vadd.f32 %v2055_v9, %v1912_v0 }
 0x7f9   :  { %v1934_v24 = vmax.f32 %v1930_v42, 0.0 }
 0x7fa   :  { %v1933_v31 = vmax.f32 %v1929_v1, 0.0 }
 0x7fb   :  { %1938 = vst.msk [vmem:[#allocation2 + $0x18] sm:$0xff] %vm361_vm2, %v1934_v24 }
 0x7fc   :  { %1937 = vst.msk [vmem:[#allocation2 + $0x10] sm:$0xff] %vm361_vm2, %v1933_v31 }
 0x7fd   :  { %2592 = shalt.err (!%p2589_p4)
}
 0x7fe   :  { %s2593_s26 = scalar_lea.hbm %s3187_s20, 512 }
 0x7ff   :  { %p2594_p5 = scmp.ne.s32.totalorder %s3187_s20, %s2593_s26  ;;  %p2597_p6 = scmp.lt.u32.totalorder %s2593_s26, %s3187_s20 }
 0x801   :  { %p2599_p7 = pnand %p2597_p6, %p2594_p5 }
 0x803   :  { %2602 = shalt.err (!%p2599_p7)
}
 0x804   :  { %s2608_s29 = smov 128   ;;  %s2609_s30 = smov 8  }
 0x805   :  { %1950 = dma.vmem_to_hbm [thread:$0]  %s1945_s9, 512, %s3187_s20, [#allocation3], %s2608_s29, %s2608_s29, %s2609_s30  }
 0x806   :  { %2603 = dma.done.wait [#allocation3], 512  }
 0x807   :  { %2604 = vsyncadd [#allocation3], 4294966784 }
 0x808   :  { %1954 = vsyncpa [#allocation3], 1 }

</bundles_post_ra>
